<compile_context>
chip_gen: v5e
topology: v5e:2x2
jax: 0.10.0
libtpu: 0.0.40
codegen_flags: <defaults>
</compile_context>

<pallas_src>
import jax
import jax.numpy as jnp
from jax.experimental import pallas as pl
from jax.experimental.pallas import tpu as pltpu


# ---------------------------------------------------------------------------
# Kernel
# ---------------------------------------------------------------------------
def _make_bilstm_stack_kernel(T, B, H, Dpad):
    """Kernel for the whole bidirectional LSTM stack (grid axis = layer)."""
    H2, H3, H4, H8 = 2 * H, 3 * H, 4 * H, 8 * H

    def kernel(x_ref, wih_ref, whh_ref, b_ref, hn_ref, cn_ref, seq_ref):
        layer = pl.program_id(0)

        # Layer 0 input is the (padded) embedding; later layers read the
        # previous layer's output already sitting in the VMEM scratch.
        @pl.when(layer == 0)
        def _():
            seq_ref[...] = x_ref[...]

        # Hoisted input projection for all T steps and both directions:
        # (T*B, Dpad) @ (Dpad, 8H) + bias -> (T*B, 8H).  Off the serial path.
        gx = (jnp.dot(seq_ref[...], wih_ref[0],
                      preferred_element_type=jnp.float32) + b_ref[0])

        whh = whh_ref[0]                                   # (2H, 8H) block-diag
        hcat = jnp.zeros((B, H2), jnp.float32)             # [h_fwd | h_bwd]
        c0 = jnp.zeros((B, H), jnp.float32)
        c1 = jnp.zeros((B, H), jnp.float32)

        outs_f = []
        outs_b = []
        # Fully unrolled recurrence.  Forward direction walks t = s,
        # reverse direction walks t = T-1-s (no reversal copies).
        for s in range(T):
            g_hh = jnp.dot(hcat, whh, preferred_element_type=jnp.float32)
            g0 = g_hh[:, :H4] + gx[s * B:(s + 1) * B, :H4]
            g1 = g_hh[:, H4:] + gx[(T - 1 - s) * B:(T - s) * B, H4:]

            # gate layout per direction: [i, f, o, g]
            s0 = jax.nn.sigmoid(g0[:, :H3])
            s1 = jax.nn.sigmoid(g1[:, :H3])
            gg0 = jnp.tanh(g0[:, H3:])
            gg1 = jnp.tanh(g1[:, H3:])

            c0 = s0[:, H:H2] * c0 + s0[:, :H] * gg0
            c1 = s1[:, H:H2] * c1 + s1[:, :H] * gg1
            h0 = s0[:, H2:H3] * jnp.tanh(c0)
            h1 = s1[:, H2:H3] * jnp.tanh(c1)

            hcat = jnp.concatenate([h0, h1], axis=-1)
            outs_f.append(h0)
            outs_b.append(h1)

        # Final states; PyTorch ordering: index = layer * 2 + direction.
        hn_ref[0] = hcat[:, :H]
        hn_ref[1] = hcat[:, H:]
        cn_ref[0] = c0
        cn_ref[1] = c1

        # Assemble next layer's input sequence (time-ordered, [fwd | bwd])
        # and store it once.  Columns [2H:Dpad] (if any) are multiplied by
        # zero-padded W_ih rows, so they need not be cleared.
        rows = [jnp.concatenate([outs_f[s], outs_b[T - 1 - s]], axis=-1)
                for s in range(T)]
        seq_ref[:, :H2] = jnp.concatenate(rows, axis=0)

    return kernel


# ---------------------------------------------------------------------------
# Parameters (PyTorch layout) + kernel-ready fused weights
# ---------------------------------------------------------------------------
def _perm_gates(w, H):
    """Reorder the 4H gate axis (last axis) from (i,f,g,o) to (i,f,o,g)."""
    return jnp.concatenate(
        [w[..., :2 * H], w[..., 3 * H:4 * H], w[..., 2 * H:3 * H]], axis=-1)


def _fuse_weights(raw, n_layers, H, embed_dim, Dpad):
    """Build stacked, gate-permuted, direction-fused kernel weights."""
    wih_all, whh_all, b_all = [], [], []
    for layer in range(n_layers):
        ih_halves, b_halves = [], []
        whh_f = jnp.zeros((2 * H, 8 * H), jnp.float32)
        for d in range(2):
            w_ih, w_hh, b_ih, b_hh = raw[(layer, d)]
            w_ih_t = _perm_gates(w_ih.T, H)                 # (in, 4H)
            pad = Dpad - w_ih_t.shape[0]
            if pad > 0:
                w_ih_t = jnp.pad(w_ih_t, ((0, pad), (0, 0)))
            ih_halves.append(w_ih_t)                        # (Dpad, 4H)
            b_halves.append(_perm_gates(b_ih + b_hh, H))    # (4H,)
            whh_f = whh_f.at[d * H:(d + 1) * H,
                             d * 4 * H:(d + 1) * 4 * H].set(
                                 _perm_gates(w_hh.T, H))
        wih_all.append(jnp.concatenate(ih_halves, axis=1))  # (Dpad, 8H)
        whh_all.append(whh_f)                               # (2H, 8H)
        b_all.append(jnp.concatenate(b_halves)[None, :])    # (1, 8H)
    return (jnp.stack(wih_all), jnp.stack(whh_all), jnp.stack(b_all))


def init_params(key, vocab_size, embed_dim, n_layers, n_hidden):
    params = {"n_layers": n_layers, "n_hidden": n_hidden,
              "embed_dim": embed_dim}
    key, k_emb = jax.random.split(key)
    params["embed"] = 0.1 * jax.random.normal(
        k_emb, (vocab_size, embed_dim), jnp.float32)

    bound = 1.0 / (n_hidden ** 0.5)
    raw = {}
    for layer in range(n_layers):
        in_size = embed_dim if layer == 0 else 2 * n_hidden
        for d in range(2):  # 0 = forward, 1 = reverse
            key, k1, k2, k3, k4 = jax.random.split(key, 5)
            w_ih = jax.random.uniform(k1, (4 * n_hidden, in_size),
                                      jnp.float32, -bound, bound)
            w_hh = jax.random.uniform(k2, (4 * n_hidden, n_hidden),
                                      jnp.float32, -bound, bound)
            b_ih = jax.random.uniform(k3, (4 * n_hidden,),
                                      jnp.float32, -bound, bound)
            b_hh = jax.random.uniform(k4, (4 * n_hidden,),
                                      jnp.float32, -bound, bound)
            raw[(layer, d)] = (w_ih, w_hh, b_ih, b_hh)
    params["lstm_raw"] = raw

    Dpad = max(embed_dim, 2 * n_hidden)
    params["Dpad"] = Dpad
    params["fused"] = _fuse_weights(raw, n_layers, n_hidden, embed_dim, Dpad)
    return params


# ---------------------------------------------------------------------------
# Forward (Pallas)
# ---------------------------------------------------------------------------
def encoder_forward(params, tokens):
    """tokens: (B, T) int32.  Returns (h_n, c_n), each (2*n_layers, B, H)."""
    L = params["n_layers"]
    H = params["n_hidden"]
    E = params["embed_dim"]
    Dpad = params["Dpad"]
    B, T = tokens.shape

    # Embedding gather + dropout(identity): plain-JAX glue.
    emb = jnp.take(params["embed"], tokens, axis=0)               # (B, T, E)
    x = jnp.transpose(emb, (1, 0, 2)).astype(jnp.float32)         # (T, B, E)
    x = x.reshape(T * B, E)
    if Dpad > E:
        x = jnp.pad(x, ((0, 0), (0, Dpad - E)))                   # (T*B, Dpad)

    wih_all, whh_all, b_all = params["fused"]
    kernel = _make_bilstm_stack_kernel(T, B, H, Dpad)

    h_n, c_n = pl.pallas_call(
        kernel,
        out_shape=(
            jax.ShapeDtypeStruct((2 * L, B, H), jnp.float32),
            jax.ShapeDtypeStruct((2 * L, B, H), jnp.float32),
        ),
        grid=(L,),
        in_specs=[
            pl.BlockSpec((T * B, Dpad), lambda l: (0, 0)),
            pl.BlockSpec((1, Dpad, 8 * H), lambda l: (l, 0, 0)),
            pl.BlockSpec((1, 2 * H, 8 * H), lambda l: (l, 0, 0)),
            pl.BlockSpec((1, 1, 8 * H), lambda l: (l, 0, 0)),
        ],
        out_specs=(
            pl.BlockSpec((2, B, H), lambda l: (l, 0, 0)),
            pl.BlockSpec((2, B, H), lambda l: (l, 0, 0)),
        ),
        scratch_shapes=[pltpu.VMEM((T * B, Dpad), jnp.float32)],
        compiler_params=pltpu.CompilerParams(
            dimension_semantics=("arbitrary",)),
    )(x, wih_all, whh_all, b_all)
    return h_n, c_n


# ---------------------------------------------------------------------------
# Pure-JAX reference (uses raw PyTorch-layout weights, independent math path)
# ---------------------------------------------------------------------------
def encoder_forward_ref(params, tokens):
    emb = jnp.take(params["embed"], tokens, axis=0)
    layer_in = jnp.transpose(emb, (1, 0, 2)).astype(jnp.float32)
    T, B, _ = layer_in.shape
    H = params["n_hidden"]
    h_list, c_list = [], []
    for layer in range(params["n_layers"]):
        dir_outs = []
        for d in range(2):
            w_ih, w_hh, b_ih, b_hh = params["lstm_raw"][(layer, d)]
            x_in = layer_in if d == 0 else layer_in[::-1]
            h = jnp.zeros((B, H), jnp.float32)
            c = jnp.zeros((B, H), jnp.float32)
            outs = []
            for t in range(T):
                gates = x_in[t] @ w_ih.T + h @ w_hh.T + b_ih + b_hh
                i_g = jax.nn.sigmoid(gates[:, 0:H])
                f_g = jax.nn.sigmoid(gates[:, H:2 * H])
                g_g = jnp.tanh(gates[:, 2 * H:3 * H])
                o_g = jax.nn.sigmoid(gates[:, 3 * H:4 * H])
                c = f_g * c + i_g * g_g
                h = o_g * jnp.tanh(c)
                outs.append(h)
            out_seq = jnp.stack(outs, axis=0)
            if d == 1:
                out_seq = out_seq[::-1]
            dir_outs.append(out_seq)
            h_list.append(h)
            c_list.append(c)
        layer_in = jnp.concatenate(dir_outs, axis=-1)
    return jnp.stack(h_list, axis=0), jnp.stack(c_list, axis=0)


if __name__ == "__main__":
    VOCAB = 100
    EMBED_DIM = 32
    N_LAYERS = 2
    N_HIDDEN = 32
    B, T = 2, 8

    key = jax.random.PRNGKey(0)
    key, k_tok = jax.random.split(key)
    tokens = jax.random.randint(k_tok, (B, T), 0, VOCAB, dtype=jnp.int32)

    params = init_params(key, VOCAB, EMBED_DIM, N_LAYERS, N_HIDDEN)

    h_n, c_n = encoder_forward(params, tokens)
    jax.block_until_ready((h_n, c_n))

    assert h_n.shape == (2 * N_LAYERS, B, N_HIDDEN), h_n.shape
    assert c_n.shape == (2 * N_LAYERS, B, N_HIDDEN), c_n.shape

    h_ref, c_ref = encoder_forward_ref(params, tokens)
    assert jnp.allclose(h_n, h_ref, atol=1e-5, rtol=1e-5), "h_n mismatch"
    assert jnp.allclose(c_n, c_ref, atol=1e-5, rtol=1e-5), "c_n mismatch"

    print("KERNEL_OK")
</pallas_src>

<mosaic_0001>
module attributes {stable_mosaic.version = 11 : i64} {
  func.func @kernel(%arg0: i32, %arg1: memref<16x64xf32, #tpu.memory_space<vmem>>, %arg2: memref<1x64x256xf32, #tpu.memory_space<vmem>>, %arg3: memref<1x64x256xf32, #tpu.memory_space<vmem>>, %arg4: memref<1x1x256xf32, #tpu.memory_space<vmem>>, %arg5: memref<2x2x32xf32, #tpu.memory_space<vmem>>, %arg6: memref<2x2x32xf32, #tpu.memory_space<vmem>>, %arg7: memref<16x64xf32, #tpu.memory_space<vmem>>) attributes {dimension_semantics = [#tpu.dimension_semantics<arbitrary>], iteration_bounds = array<i64: 2>, scalar_prefetch = 0 : i64, scratch_operands = 1 : i64, tpu.core_type = #tpu.core_type<tc>, window_params = [{pipeline_mode = #tpu.pipeline_mode<synchronous>, transform_indices = @transform_0, window_bounds = array<i64: 16, 64>}, {transform_indices = @transform_1, window_bounds = array<i64: 1, 64, 256>}, {transform_indices = @transform_2, window_bounds = array<i64: 1, 64, 256>}, {transform_indices = @transform_3, window_bounds = array<i64: 1, 1, 256>}, {transform_indices = @transform_4, window_bounds = array<i64: 2, 2, 32>}, {transform_indices = @transform_5, window_bounds = array<i64: 2, 2, 32>}]} {
    %c0_i32 = arith.constant 0 : i32
    %0 = arith.cmpi eq, %arg0, %c0_i32 : i32
    %1 = arith.extui %0 : i1 to i32
    %c0_i32_0 = arith.constant 0 : i32
    %2 = arith.cmpi ne, %1, %c0_i32_0 : i32
    scf.if %2 {
      %c0_51 = arith.constant 0 : index
      %c0_52 = arith.constant 0 : index
      %360 = vector.load %arg1[%c0_51, %c0_52] : memref<16x64xf32, #tpu.memory_space<vmem>>, vector<16x64xf32>
      %c0_53 = arith.constant 0 : index
      %c0_54 = arith.constant 0 : index
      %361 = vector.load %arg7[%c0_53, %c0_54] : memref<16x64xf32, #tpu.memory_space<vmem>>, vector<16x64xf32>
      tpu.vector_store %arg7[%c0_53, %c0_54], %360 {strides = array<i32>} : memref<16x64xf32, #tpu.memory_space<vmem>>, vector<16x64xf32>,
    } else {
    }
    %c0 = arith.constant 0 : index
    %c0_1 = arith.constant 0 : index
    %3 = vector.load %arg7[%c0, %c0_1] : memref<16x64xf32, #tpu.memory_space<vmem>>, vector<16x64xf32>
    %c0_2 = arith.constant 0 : index
    %c0_3 = arith.constant 0 : index
    %c0_4 = arith.constant 0 : index
    %4 = vector.load %arg2[%c0_2, %c0_3, %c0_4] : memref<1x64x256xf32, #tpu.memory_space<vmem>>, vector<1x64x256xf32>
    %5 = vector.shape_cast %4 : vector<1x64x256xf32> to vector<64x256xf32>
    %cst = arith.constant dense<0.000000e+00> : vector<16x256xf32>
    %6 = tpu.matmul %3, %5, %cst {dimension_numbers = #tpu.dot_dimension_numbers<[1], [0], [0], [1], [0, 0, 1, 1], [], []>} : vector<16x64xf32>, vector<64x256xf32>, vector<16x256xf32> -> vector<16x256xf32>
    %c0_5 = arith.constant 0 : index
    %c0_6 = arith.constant 0 : index
    %c0_7 = arith.constant 0 : index
    %7 = vector.load %arg4[%c0_5, %c0_6, %c0_7] : memref<1x1x256xf32, #tpu.memory_space<vmem>>, vector<1x1x256xf32>
    %8 = vector.shape_cast %7 : vector<1x1x256xf32> to vector<1x256xf32>
    %9 = vector.broadcast %8 : vector<1x256xf32> to vector<16x256xf32>
    %10 = arith.addf %6, %9 : vector<16x256xf32>
    %c0_8 = arith.constant 0 : index
    %c0_9 = arith.constant 0 : index
    %c0_10 = arith.constant 0 : index
    %11 = vector.load %arg3[%c0_8, %c0_9, %c0_10] : memref<1x64x256xf32, #tpu.memory_space<vmem>>, vector<1x64x256xf32>
    %12 = vector.shape_cast %11 : vector<1x64x256xf32> to vector<64x256xf32>
    %cst_11 = arith.constant 0.000000e+00 : f32
    %13 = vector.broadcast %cst_11 : f32 to vector<2x64xf32>
    %cst_12 = arith.constant 0.000000e+00 : f32
    %14 = vector.broadcast %cst_12 : f32 to vector<2x32xf32>
    %cst_13 = arith.constant 0.000000e+00 : f32
    %15 = vector.broadcast %cst_13 : f32 to vector<2x32xf32>
    %cst_14 = arith.constant dense<0.000000e+00> : vector<2x256xf32>
    %16 = tpu.matmul %13, %12, %cst_14 {dimension_numbers = #tpu.dot_dimension_numbers<[1], [0], [0], [1], [0, 0, 1, 1], [], []>} : vector<2x64xf32>, vector<64x256xf32>, vector<2x256xf32> -> vector<2x256xf32>
    %17 = vector.extract_strided_slice %16 {offsets = [0, 0], sizes = [2, 128], strides = [1, 1]} : vector<2x256xf32> to vector<2x128xf32>
    %18 = vector.extract_strided_slice %10 {offsets = [0, 0], sizes = [2, 128], strides = [1, 1]} : vector<16x256xf32> to vector<2x128xf32>
    %19 = arith.addf %17, %18 : vector<2x128xf32>
    %20 = vector.extract_strided_slice %16 {offsets = [0, 128], sizes = [2, 128], strides = [1, 1]} : vector<2x256xf32> to vector<2x128xf32>
    %21 = vector.extract_strided_slice %10 {offsets = [14, 128], sizes = [2, 128], strides = [1, 1]} : vector<16x256xf32> to vector<2x128xf32>
    %22 = arith.addf %20, %21 : vector<2x128xf32>
    %23 = vector.extract_strided_slice %19 {offsets = [0, 0], sizes = [2, 96], strides = [1, 1]} : vector<2x128xf32> to vector<2x96xf32>
    %24 = arith.negf %23 : vector<2x96xf32>
    %25 = math.exp %24 : vector<2x96xf32>
    %cst_15 = arith.constant 1.000000e+00 : f32
    %26 = vector.broadcast %cst_15 : f32 to vector<2x96xf32>
    %27 = arith.addf %26, %25 : vector<2x96xf32>
    %28 = arith.divf %26, %27 : vector<2x96xf32>
    %29 = vector.extract_strided_slice %22 {offsets = [0, 0], sizes = [2, 96], strides = [1, 1]} : vector<2x128xf32> to vector<2x96xf32>
    %30 = arith.negf %29 : vector<2x96xf32>
    %31 = math.exp %30 : vector<2x96xf32>
    %cst_16 = arith.constant 1.000000e+00 : f32
    %32 = vector.broadcast %cst_16 : f32 to vector<2x96xf32>
    %33 = arith.addf %32, %31 : vector<2x96xf32>
    %34 = arith.divf %32, %33 : vector<2x96xf32>
    %35 = vector.extract_strided_slice %19 {offsets = [0, 96], sizes = [2, 32], strides = [1, 1]} : vector<2x128xf32> to vector<2x32xf32>
    %36 = math.tanh %35 : vector<2x32xf32>
    %37 = vector.extract_strided_slice %22 {offsets = [0, 96], sizes = [2, 32], strides = [1, 1]} : vector<2x128xf32> to vector<2x32xf32>
    %38 = math.tanh %37 : vector<2x32xf32>
    %39 = vector.extract_strided_slice %28 {offsets = [0, 32], sizes = [2, 32], strides = [1, 1]} : vector<2x96xf32> to vector<2x32xf32>
    %40 = arith.mulf %39, %14 : vector<2x32xf32>
    %41 = vector.extract_strided_slice %28 {offsets = [0, 0], sizes = [2, 32], strides = [1, 1]} : vector<2x96xf32> to vector<2x32xf32>
    %42 = arith.mulf %41, %36 : vector<2x32xf32>
    %43 = arith.addf %40, %42 : vector<2x32xf32>
    %44 = vector.extract_strided_slice %34 {offsets = [0, 32], sizes = [2, 32], strides = [1, 1]} : vector<2x96xf32> to vector<2x32xf32>
    %45 = arith.mulf %44, %15 : vector<2x32xf32>
    %46 = vector.extract_strided_slice %34 {offsets = [0, 0], sizes = [2, 32], strides = [1, 1]} : vector<2x96xf32> to vector<2x32xf32>
    %47 = arith.mulf %46, %38 : vector<2x32xf32>
    %48 = arith.addf %45, %47 : vector<2x32xf32>
    %49 = vector.extract_strided_slice %28 {offsets = [0, 64], sizes = [2, 32], strides = [1, 1]} : vector<2x96xf32> to vector<2x32xf32>
    %50 = math.tanh %43 : vector<2x32xf32>
    %51 = arith.mulf %49, %50 : vector<2x32xf32>
    %52 = vector.extract_strided_slice %34 {offsets = [0, 64], sizes = [2, 32], strides = [1, 1]} : vector<2x96xf32> to vector<2x32xf32>
    %53 = math.tanh %48 : vector<2x32xf32>
    %54 = arith.mulf %52, %53 : vector<2x32xf32>
    %55 = tpu.concatenate %51, %54 in 1 : vector<2x32xf32>, vector<2x32xf32> -> vector<2x64xf32>
    %cst_17 = arith.constant dense<0.000000e+00> : vector<2x256xf32>
    %56 = tpu.matmul %55, %12, %cst_17 {dimension_numbers = #tpu.dot_dimension_numbers<[1], [0], [0], [1], [0, 0, 1, 1], [], []>} : vector<2x64xf32>, vector<64x256xf32>, vector<2x256xf32> -> vector<2x256xf32>
    %57 = vector.extract_strided_slice %56 {offsets = [0, 0], sizes = [2, 128], strides = [1, 1]} : vector<2x256xf32> to vector<2x128xf32>
    %58 = vector.extract_strided_slice %10 {offsets = [2, 0], sizes = [2, 128], strides = [1, 1]} : vector<16x256xf32> to vector<2x128xf32>
    %59 = arith.addf %57, %58 : vector<2x128xf32>
    %60 = vector.extract_strided_slice %56 {offsets = [0, 128], sizes = [2, 128], strides = [1, 1]} : vector<2x256xf32> to vector<2x128xf32>
    %61 = vector.extract_strided_slice %10 {offsets = [12, 128], sizes = [2, 128], strides = [1, 1]} : vector<16x256xf32> to vector<2x128xf32>
    %62 = arith.addf %60, %61 : vector<2x128xf32>
    %63 = vector.extract_strided_slice %59 {offsets = [0, 0], sizes = [2, 96], strides = [1, 1]} : vector<2x128xf32> to vector<2x96xf32>
    %64 = arith.negf %63 : vector<2x96xf32>
    %65 = math.exp %64 : vector<2x96xf32>
    %cst_18 = arith.constant 1.000000e+00 : f32
    %66 = vector.broadcast %cst_18 : f32 to vector<2x96xf32>
    %67 = arith.addf %66, %65 : vector<2x96xf32>
    %68 = arith.divf %66, %67 : vector<2x96xf32>
    %69 = vector.extract_strided_slice %62 {offsets = [0, 0], sizes = [2, 96], strides = [1, 1]} : vector<2x128xf32> to vector<2x96xf32>
    %70 = arith.negf %69 : vector<2x96xf32>
    %71 = math.exp %70 : vector<2x96xf32>
    %cst_19 = arith.constant 1.000000e+00 : f32
    %72 = vector.broadcast %cst_19 : f32 to vector<2x96xf32>
    %73 = arith.addf %72, %71 : vector<2x96xf32>
    %74 = arith.divf %72, %73 : vector<2x96xf32>
    %75 = vector.extract_strided_slice %59 {offsets = [0, 96], sizes = [2, 32], strides = [1, 1]} : vector<2x128xf32> to vector<2x32xf32>
    %76 = math.tanh %75 : vector<2x32xf32>
    %77 = vector.extract_strided_slice %62 {offsets = [0, 96], sizes = [2, 32], strides = [1, 1]} : vector<2x128xf32> to vector<2x32xf32>
    %78 = math.tanh %77 : vector<2x32xf32>
    %79 = vector.extract_strided_slice %68 {offsets = [0, 32], sizes = [2, 32], strides = [1, 1]} : vector<2x96xf32> to vector<2x32xf32>
    %80 = arith.mulf %79, %43 : vector<2x32xf32>
    %81 = vector.extract_strided_slice %68 {offsets = [0, 0], sizes = [2, 32], strides = [1, 1]} : vector<2x96xf32> to vector<2x32xf32>
    %82 = arith.mulf %81, %76 : vector<2x32xf32>
    %83 = arith.addf %80, %82 : vector<2x32xf32>
    %84 = vector.extract_strided_slice %74 {offsets = [0, 32], sizes = [2, 32], strides = [1, 1]} : vector<2x96xf32> to vector<2x32xf32>
    %85 = arith.mulf %84, %48 : vector<2x32xf32>
    %86 = vector.extract_strided_slice %74 {offsets = [0, 0], sizes = [2, 32], strides = [1, 1]} : vector<2x96xf32> to vector<2x32xf32>
    %87 = arith.mulf %86, %78 : vector<2x32xf32>
    %88 = arith.addf %85, %87 : vector<2x32xf32>
    %89 = vector.extract_strided_slice %68 {offsets = [0, 64], sizes = [2, 32], strides = [1, 1]} : vector<2x96xf32> to vector<2x32xf32>
    %90 = math.tanh %83 : vector<2x32xf32>
    %91 = arith.mulf %89, %90 : vector<2x32xf32>
    %92 = vector.extract_strided_slice %74 {offsets = [0, 64], sizes = [2, 32], strides = [1, 1]} : vector<2x96xf32> to vector<2x32xf32>
    %93 = math.tanh %88 : vector<2x32xf32>
    %94 = arith.mulf %92, %93 : vector<2x32xf32>
    %95 = tpu.concatenate %91, %94 in 1 : vector<2x32xf32>, vector<2x32xf32> -> vector<2x64xf32>
    %cst_20 = arith.constant dense<0.000000e+00> : vector<2x256xf32>
    %96 = tpu.matmul %95, %12, %cst_20 {dimension_numbers = #tpu.dot_dimension_numbers<[1], [0], [0], [1], [0, 0, 1, 1], [], []>} : vector<2x64xf32>, vector<64x256xf32>, vector<2x256xf32> -> vector<2x256xf32>
    %97 = vector.extract_strided_slice %96 {offsets = [0, 0], sizes = [2, 128], strides = [1, 1]} : vector<2x256xf32> to vector<2x128xf32>
    %98 = vector.extract_strided_slice %10 {offsets = [4, 0], sizes = [2, 128], strides = [1, 1]} : vector<16x256xf32> to vector<2x128xf32>
    %99 = arith.addf %97, %98 : vector<2x128xf32>
    %100 = vector.extract_strided_slice %96 {offsets = [0, 128], sizes = [2, 128], strides = [1, 1]} : vector<2x256xf32> to vector<2x128xf32>
    %101 = vector.extract_strided_slice %10 {offsets = [10, 128], sizes = [2, 128], strides = [1, 1]} : vector<16x256xf32> to vector<2x128xf32>
    %102 = arith.addf %100, %101 : vector<2x128xf32>
    %103 = vector.extract_strided_slice %99 {offsets = [0, 0], sizes = [2, 96], strides = [1, 1]} : vector<2x128xf32> to vector<2x96xf32>
    %104 = arith.negf %103 : vector<2x96xf32>
    %105 = math.exp %104 : vector<2x96xf32>
    %cst_21 = arith.constant 1.000000e+00 : f32
    %106 = vector.broadcast %cst_21 : f32 to vector<2x96xf32>
    %107 = arith.addf %106, %105 : vector<2x96xf32>
    %108 = arith.divf %106, %107 : vector<2x96xf32>
    %109 = vector.extract_strided_slice %102 {offsets = [0, 0], sizes = [2, 96], strides = [1, 1]} : vector<2x128xf32> to vector<2x96xf32>
    %110 = arith.negf %109 : vector<2x96xf32>
    %111 = math.exp %110 : vector<2x96xf32>
    %cst_22 = arith.constant 1.000000e+00 : f32
    %112 = vector.broadcast %cst_22 : f32 to vector<2x96xf32>
    %113 = arith.addf %112, %111 : vector<2x96xf32>
    %114 = arith.divf %112, %113 : vector<2x96xf32>
    %115 = vector.extract_strided_slice %99 {offsets = [0, 96], sizes = [2, 32], strides = [1, 1]} : vector<2x128xf32> to vector<2x32xf32>
    %116 = math.tanh %115 : vector<2x32xf32>
    %117 = vector.extract_strided_slice %102 {offsets = [0, 96], sizes = [2, 32], strides = [1, 1]} : vector<2x128xf32> to vector<2x32xf32>
    %118 = math.tanh %117 : vector<2x32xf32>
    %119 = vector.extract_strided_slice %108 {offsets = [0, 32], sizes = [2, 32], strides = [1, 1]} : vector<2x96xf32> to vector<2x32xf32>
    %120 = arith.mulf %119, %83 : vector<2x32xf32>
    %121 = vector.extract_strided_slice %108 {offsets = [0, 0], sizes = [2, 32], strides = [1, 1]} : vector<2x96xf32> to vector<2x32xf32>
    %122 = arith.mulf %121, %116 : vector<2x32xf32>
    %123 = arith.addf %120, %122 : vector<2x32xf32>
    %124 = vector.extract_strided_slice %114 {offsets = [0, 32], sizes = [2, 32], strides = [1, 1]} : vector<2x96xf32> to vector<2x32xf32>
    %125 = arith.mulf %124, %88 : vector<2x32xf32>
    %126 = vector.extract_strided_slice %114 {offsets = [0, 0], sizes = [2, 32], strides = [1, 1]} : vector<2x96xf32> to vector<2x32xf32>
    %127 = arith.mulf %126, %118 : vector<2x32xf32>
    %128 = arith.addf %125, %127 : vector<2x32xf32>
    %129 = vector.extract_strided_slice %108 {offsets = [0, 64], sizes = [2, 32], strides = [1, 1]} : vector<2x96xf32> to vector<2x32xf32>
    %130 = math.tanh %123 : vector<2x32xf32>
    %131 = arith.mulf %129, %130 : vector<2x32xf32>
    %132 = vector.extract_strided_slice %114 {offsets = [0, 64], sizes = [2, 32], strides = [1, 1]} : vector<2x96xf32> to vector<2x32xf32>
    %133 = math.tanh %128 : vector<2x32xf32>
    %134 = arith.mulf %132, %133 : vector<2x32xf32>
    %135 = tpu.concatenate %131, %134 in 1 : vector<2x32xf32>, vector<2x32xf32> -> vector<2x64xf32>
    %cst_23 = arith.constant dense<0.000000e+00> : vector<2x256xf32>
    %136 = tpu.matmul %135, %12, %cst_23 {dimension_numbers = #tpu.dot_dimension_numbers<[1], [0], [0], [1], [0, 0, 1, 1], [], []>} : vector<2x64xf32>, vector<64x256xf32>, vector<2x256xf32> -> vector<2x256xf32>
    %137 = vector.extract_strided_slice %136 {offsets = [0, 0], sizes = [2, 128], strides = [1, 1]} : vector<2x256xf32> to vector<2x128xf32>
    %138 = vector.extract_strided_slice %10 {offsets = [6, 0], sizes = [2, 128], strides = [1, 1]} : vector<16x256xf32> to vector<2x128xf32>
    %139 = arith.addf %137, %138 : vector<2x128xf32>
    %140 = vector.extract_strided_slice %136 {offsets = [0, 128], sizes = [2, 128], strides = [1, 1]} : vector<2x256xf32> to vector<2x128xf32>
    %141 = vector.extract_strided_slice %10 {offsets = [8, 128], sizes = [2, 128], strides = [1, 1]} : vector<16x256xf32> to vector<2x128xf32>
    %142 = arith.addf %140, %141 : vector<2x128xf32>
    %143 = vector.extract_strided_slice %139 {offsets = [0, 0], sizes = [2, 96], strides = [1, 1]} : vector<2x128xf32> to vector<2x96xf32>
    %144 = arith.negf %143 : vector<2x96xf32>
    %145 = math.exp %144 : vector<2x96xf32>
    %cst_24 = arith.constant 1.000000e+00 : f32
    %146 = vector.broadcast %cst_24 : f32 to vector<2x96xf32>
    %147 = arith.addf %146, %145 : vector<2x96xf32>
    %148 = arith.divf %146, %147 : vector<2x96xf32>
    %149 = vector.extract_strided_slice %142 {offsets = [0, 0], sizes = [2, 96], strides = [1, 1]} : vector<2x128xf32> to vector<2x96xf32>
    %150 = arith.negf %149 : vector<2x96xf32>
    %151 = math.exp %150 : vector<2x96xf32>
    %cst_25 = arith.constant 1.000000e+00 : f32
    %152 = vector.broadcast %cst_25 : f32 to vector<2x96xf32>
    %153 = arith.addf %152, %151 : vector<2x96xf32>
    %154 = arith.divf %152, %153 : vector<2x96xf32>
    %155 = vector.extract_strided_slice %139 {offsets = [0, 96], sizes = [2, 32], strides = [1, 1]} : vector<2x128xf32> to vector<2x32xf32>
    %156 = math.tanh %155 : vector<2x32xf32>
    %157 = vector.extract_strided_slice %142 {offsets = [0, 96], sizes = [2, 32], strides = [1, 1]} : vector<2x128xf32> to vector<2x32xf32>
    %158 = math.tanh %157 : vector<2x32xf32>
    %159 = vector.extract_strided_slice %148 {offsets = [0, 32], sizes = [2, 32], strides = [1, 1]} : vector<2x96xf32> to vector<2x32xf32>
    %160 = arith.mulf %159, %123 : vector<2x32xf32>
    %161 = vector.extract_strided_slice %148 {offsets = [0, 0], sizes = [2, 32], strides = [1, 1]} : vector<2x96xf32> to vector<2x32xf32>
    %162 = arith.mulf %161, %156 : vector<2x32xf32>
    %163 = arith.addf %160, %162 : vector<2x32xf32>
    %164 = vector.extract_strided_slice %154 {offsets = [0, 32], sizes = [2, 32], strides = [1, 1]} : vector<2x96xf32> to vector<2x32xf32>
    %165 = arith.mulf %164, %128 : vector<2x32xf32>
    %166 = vector.extract_strided_slice %154 {offsets = [0, 0], sizes = [2, 32], strides = [1, 1]} : vector<2x96xf32> to vector<2x32xf32>
    %167 = arith.mulf %166, %158 : vector<2x32xf32>
    %168 = arith.addf %165, %167 : vector<2x32xf32>
    %169 = vector.extract_strided_slice %148 {offsets = [0, 64], sizes = [2, 32], strides = [1, 1]} : vector<2x96xf32> to vector<2x32xf32>
    %170 = math.tanh %163 : vector<2x32xf32>
    %171 = arith.mulf %169, %170 : vector<2x32xf32>
    %172 = vector.extract_strided_slice %154 {offsets = [0, 64], sizes = [2, 32], strides = [1, 1]} : vector<2x96xf32> to vector<2x32xf32>
    %173 = math.tanh %168 : vector<2x32xf32>
    %174 = arith.mulf %172, %173 : vector<2x32xf32>
    %175 = tpu.concatenate %171, %174 in 1 : vector<2x32xf32>, vector<2x32xf32> -> vector<2x64xf32>
    %cst_26 = arith.constant dense<0.000000e+00> : vector<2x256xf32>
    %176 = tpu.matmul %175, %12, %cst_26 {dimension_numbers = #tpu.dot_dimension_numbers<[1], [0], [0], [1], [0, 0, 1, 1], [], []>} : vector<2x64xf32>, vector<64x256xf32>, vector<2x256xf32> -> vector<2x256xf32>
    %177 = vector.extract_strided_slice %176 {offsets = [0, 0], sizes = [2, 128], strides = [1, 1]} : vector<2x256xf32> to vector<2x128xf32>
    %178 = vector.extract_strided_slice %10 {offsets = [8, 0], sizes = [2, 128], strides = [1, 1]} : vector<16x256xf32> to vector<2x128xf32>
    %179 = arith.addf %177, %178 : vector<2x128xf32>
    %180 = vector.extract_strided_slice %176 {offsets = [0, 128], sizes = [2, 128], strides = [1, 1]} : vector<2x256xf32> to vector<2x128xf32>
    %181 = vector.extract_strided_slice %10 {offsets = [6, 128], sizes = [2, 128], strides = [1, 1]} : vector<16x256xf32> to vector<2x128xf32>
    %182 = arith.addf %180, %181 : vector<2x128xf32>
    %183 = vector.extract_strided_slice %179 {offsets = [0, 0], sizes = [2, 96], strides = [1, 1]} : vector<2x128xf32> to vector<2x96xf32>
    %184 = arith.negf %183 : vector<2x96xf32>
    %185 = math.exp %184 : vector<2x96xf32>
    %cst_27 = arith.constant 1.000000e+00 : f32
    %186 = vector.broadcast %cst_27 : f32 to vector<2x96xf32>
    %187 = arith.addf %186, %185 : vector<2x96xf32>
    %188 = arith.divf %186, %187 : vector<2x96xf32>
    %189 = vector.extract_strided_slice %182 {offsets = [0, 0], sizes = [2, 96], strides = [1, 1]} : vector<2x128xf32> to vector<2x96xf32>
    %190 = arith.negf %189 : vector<2x96xf32>
    %191 = math.exp %190 : vector<2x96xf32>
    %cst_28 = arith.constant 1.000000e+00 : f32
    %192 = vector.broadcast %cst_28 : f32 to vector<2x96xf32>
    %193 = arith.addf %192, %191 : vector<2x96xf32>
    %194 = arith.divf %192, %193 : vector<2x96xf32>
    %195 = vector.extract_strided_slice %179 {offsets = [0, 96], sizes = [2, 32], strides = [1, 1]} : vector<2x128xf32> to vector<2x32xf32>
    %196 = math.tanh %195 : vector<2x32xf32>
    %197 = vector.extract_strided_slice %182 {offsets = [0, 96], sizes = [2, 32], strides = [1, 1]} : vector<2x128xf32> to vector<2x32xf32>
    %198 = math.tanh %197 : vector<2x32xf32>
    %199 = vector.extract_strided_slice %188 {offsets = [0, 32], sizes = [2, 32], strides = [1, 1]} : vector<2x96xf32> to vector<2x32xf32>
    %200 = arith.mulf %199, %163 : vector<2x32xf32>
    %201 = vector.extract_strided_slice %188 {offsets = [0, 0], sizes = [2, 32], strides = [1, 1]} : vector<2x96xf32> to vector<2x32xf32>
    %202 = arith.mulf %201, %196 : vector<2x32xf32>
    %203 = arith.addf %200, %202 : vector<2x32xf32>
    %204 = vector.extract_strided_slice %194 {offsets = [0, 32], sizes = [2, 32], strides = [1, 1]} : vector<2x96xf32> to vector<2x32xf32>
    %205 = arith.mulf %204, %168 : vector<2x32xf32>
    %206 = vector.extract_strided_slice %194 {offsets = [0, 0], sizes = [2, 32], strides = [1, 1]} : vector<2x96xf32> to vector<2x32xf32>
    %207 = arith.mulf %206, %198 : vector<2x32xf32>
    %208 = arith.addf %205, %207 : vector<2x32xf32>
    %209 = vector.extract_strided_slice %188 {offsets = [0, 64], sizes = [2, 32], strides = [1, 1]} : vector<2x96xf32> to vector<2x32xf32>
    %210 = math.tanh %203 : vector<2x32xf32>
    %211 = arith.mulf %209, %210 : vector<2x32xf32>
    %212 = vector.extract_strided_slice %194 {offsets = [0, 64], sizes = [2, 32], strides = [1, 1]} : vector<2x96xf32> to vector<2x32xf32>
    %213 = math.tanh %208 : vector<2x32xf32>
    %214 = arith.mulf %212, %213 : vector<2x32xf32>
    %215 = tpu.concatenate %211, %214 in 1 : vector<2x32xf32>, vector<2x32xf32> -> vector<2x64xf32>
    %cst_29 = arith.constant dense<0.000000e+00> : vector<2x256xf32>
    %216 = tpu.matmul %215, %12, %cst_29 {dimension_numbers = #tpu.dot_dimension_numbers<[1], [0], [0], [1], [0, 0, 1, 1], [], []>} : vector<2x64xf32>, vector<64x256xf32>, vector<2x256xf32> -> vector<2x256xf32>
    %217 = vector.extract_strided_slice %216 {offsets = [0, 0], sizes = [2, 128], strides = [1, 1]} : vector<2x256xf32> to vector<2x128xf32>
    %218 = vector.extract_strided_slice %10 {offsets = [10, 0], sizes = [2, 128], strides = [1, 1]} : vector<16x256xf32> to vector<2x128xf32>
    %219 = arith.addf %217, %218 : vector<2x128xf32>
    %220 = vector.extract_strided_slice %216 {offsets = [0, 128], sizes = [2, 128], strides = [1, 1]} : vector<2x256xf32> to vector<2x128xf32>
    %221 = vector.extract_strided_slice %10 {offsets = [4, 128], sizes = [2, 128], strides = [1, 1]} : vector<16x256xf32> to vector<2x128xf32>
    %222 = arith.addf %220, %221 : vector<2x128xf32>
    %223 = vector.extract_strided_slice %219 {offsets = [0, 0], sizes = [2, 96], strides = [1, 1]} : vector<2x128xf32> to vector<2x96xf32>
    %224 = arith.negf %223 : vector<2x96xf32>
    %225 = math.exp %224 : vector<2x96xf32>
    %cst_30 = arith.constant 1.000000e+00 : f32
    %226 = vector.broadcast %cst_30 : f32 to vector<2x96xf32>
    %227 = arith.addf %226, %225 : vector<2x96xf32>
    %228 = arith.divf %226, %227 : vector<2x96xf32>
    %229 = vector.extract_strided_slice %222 {offsets = [0, 0], sizes = [2, 96], strides = [1, 1]} : vector<2x128xf32> to vector<2x96xf32>
    %230 = arith.negf %229 : vector<2x96xf32>
    %231 = math.exp %230 : vector<2x96xf32>
    %cst_31 = arith.constant 1.000000e+00 : f32
    %232 = vector.broadcast %cst_31 : f32 to vector<2x96xf32>
    %233 = arith.addf %232, %231 : vector<2x96xf32>
    %234 = arith.divf %232, %233 : vector<2x96xf32>
    %235 = vector.extract_strided_slice %219 {offsets = [0, 96], sizes = [2, 32], strides = [1, 1]} : vector<2x128xf32> to vector<2x32xf32>
    %236 = math.tanh %235 : vector<2x32xf32>
    %237 = vector.extract_strided_slice %222 {offsets = [0, 96], sizes = [2, 32], strides = [1, 1]} : vector<2x128xf32> to vector<2x32xf32>
    %238 = math.tanh %237 : vector<2x32xf32>
    %239 = vector.extract_strided_slice %228 {offsets = [0, 32], sizes = [2, 32], strides = [1, 1]} : vector<2x96xf32> to vector<2x32xf32>
    %240 = arith.mulf %239, %203 : vector<2x32xf32>
    %241 = vector.extract_strided_slice %228 {offsets = [0, 0], sizes = [2, 32], strides = [1, 1]} : vector<2x96xf32> to vector<2x32xf32>
    %242 = arith.mulf %241, %236 : vector<2x32xf32>
    %243 = arith.addf %240, %242 : vector<2x32xf32>
    %244 = vector.extract_strided_slice %234 {offsets = [0, 32], sizes = [2, 32], strides = [1, 1]} : vector<2x96xf32> to vector<2x32xf32>
    %245 = arith.mulf %244, %208 : vector<2x32xf32>
    %246 = vector.extract_strided_slice %234 {offsets = [0, 0], sizes = [2, 32], strides = [1, 1]} : vector<2x96xf32> to vector<2x32xf32>
    %247 = arith.mulf %246, %238 : vector<2x32xf32>
    %248 = arith.addf %245, %247 : vector<2x32xf32>
    %249 = vector.extract_strided_slice %228 {offsets = [0, 64], sizes = [2, 32], strides = [1, 1]} : vector<2x96xf32> to vector<2x32xf32>
    %250 = math.tanh %243 : vector<2x32xf32>
    %251 = arith.mulf %249, %250 : vector<2x32xf32>
    %252 = vector.extract_strided_slice %234 {offsets = [0, 64], sizes = [2, 32], strides = [1, 1]} : vector<2x96xf32> to vector<2x32xf32>
    %253 = math.tanh %248 : vector<2x32xf32>
    %254 = arith.mulf %252, %253 : vector<2x32xf32>
    %255 = tpu.concatenate %251, %254 in 1 : vector<2x32xf32>, vector<2x32xf32> -> vector<2x64xf32>
    %cst_32 = arith.constant dense<0.000000e+00> : vector<2x256xf32>
    %256 = tpu.matmul %255, %12, %cst_32 {dimension_numbers = #tpu.dot_dimension_numbers<[1], [0], [0], [1], [0, 0, 1, 1], [], []>} : vector<2x64xf32>, vector<64x256xf32>, vector<2x256xf32> -> vector<2x256xf32>
    %257 = vector.extract_strided_slice %256 {offsets = [0, 0], sizes = [2, 128], strides = [1, 1]} : vector<2x256xf32> to vector<2x128xf32>
    %258 = vector.extract_strided_slice %10 {offsets = [12, 0], sizes = [2, 128], strides = [1, 1]} : vector<16x256xf32> to vector<2x128xf32>
    %259 = arith.addf %257, %258 : vector<2x128xf32>
    %260 = vector.extract_strided_slice %256 {offsets = [0, 128], sizes = [2, 128], strides = [1, 1]} : vector<2x256xf32> to vector<2x128xf32>
    %261 = vector.extract_strided_slice %10 {offsets = [2, 128], sizes = [2, 128], strides = [1, 1]} : vector<16x256xf32> to vector<2x128xf32>
    %262 = arith.addf %260, %261 : vector<2x128xf32>
    %263 = vector.extract_strided_slice %259 {offsets = [0, 0], sizes = [2, 96], strides = [1, 1]} : vector<2x128xf32> to vector<2x96xf32>
    %264 = arith.negf %263 : vector<2x96xf32>
    %265 = math.exp %264 : vector<2x96xf32>
    %cst_33 = arith.constant 1.000000e+00 : f32
    %266 = vector.broadcast %cst_33 : f32 to vector<2x96xf32>
    %267 = arith.addf %266, %265 : vector<2x96xf32>
    %268 = arith.divf %266, %267 : vector<2x96xf32>
    %269 = vector.extract_strided_slice %262 {offsets = [0, 0], sizes = [2, 96], strides = [1, 1]} : vector<2x128xf32> to vector<2x96xf32>
    %270 = arith.negf %269 : vector<2x96xf32>
    %271 = math.exp %270 : vector<2x96xf32>
    %cst_34 = arith.constant 1.000000e+00 : f32
    %272 = vector.broadcast %cst_34 : f32 to vector<2x96xf32>
    %273 = arith.addf %272, %271 : vector<2x96xf32>
    %274 = arith.divf %272, %273 : vector<2x96xf32>
    %275 = vector.extract_strided_slice %259 {offsets = [0, 96], sizes = [2, 32], strides = [1, 1]} : vector<2x128xf32> to vector<2x32xf32>
    %276 = math.tanh %275 : vector<2x32xf32>
    %277 = vector.extract_strided_slice %262 {offsets = [0, 96], sizes = [2, 32], strides = [1, 1]} : vector<2x128xf32> to vector<2x32xf32>
    %278 = math.tanh %277 : vector<2x32xf32>
    %279 = vector.extract_strided_slice %268 {offsets = [0, 32], sizes = [2, 32], strides = [1, 1]} : vector<2x96xf32> to vector<2x32xf32>
    %280 = arith.mulf %279, %243 : vector<2x32xf32>
    %281 = vector.extract_strided_slice %268 {offsets = [0, 0], sizes = [2, 32], strides = [1, 1]} : vector<2x96xf32> to vector<2x32xf32>
    %282 = arith.mulf %281, %276 : vector<2x32xf32>
    %283 = arith.addf %280, %282 : vector<2x32xf32>
    %284 = vector.extract_strided_slice %274 {offsets = [0, 32], sizes = [2, 32], strides = [1, 1]} : vector<2x96xf32> to vector<2x32xf32>
    %285 = arith.mulf %284, %248 : vector<2x32xf32>
    %286 = vector.extract_strided_slice %274 {offsets = [0, 0], sizes = [2, 32], strides = [1, 1]} : vector<2x96xf32> to vector<2x32xf32>
    %287 = arith.mulf %286, %278 : vector<2x32xf32>
    %288 = arith.addf %285, %287 : vector<2x32xf32>
    %289 = vector.extract_strided_slice %268 {offsets = [0, 64], sizes = [2, 32], strides = [1, 1]} : vector<2x96xf32> to vector<2x32xf32>
    %290 = math.tanh %283 : vector<2x32xf32>
    %291 = arith.mulf %289, %290 : vector<2x32xf32>
    %292 = vector.extract_strided_slice %274 {offsets = [0, 64], sizes = [2, 32], strides = [1, 1]} : vector<2x96xf32> to vector<2x32xf32>
    %293 = math.tanh %288 : vector<2x32xf32>
    %294 = arith.mulf %292, %293 : vector<2x32xf32>
    %295 = tpu.concatenate %291, %294 in 1 : vector<2x32xf32>, vector<2x32xf32> -> vector<2x64xf32>
    %cst_35 = arith.constant dense<0.000000e+00> : vector<2x256xf32>
    %296 = tpu.matmul %295, %12, %cst_35 {dimension_numbers = #tpu.dot_dimension_numbers<[1], [0], [0], [1], [0, 0, 1, 1], [], []>} : vector<2x64xf32>, vector<64x256xf32>, vector<2x256xf32> -> vector<2x256xf32>
    %297 = vector.extract_strided_slice %296 {offsets = [0, 0], sizes = [2, 128], strides = [1, 1]} : vector<2x256xf32> to vector<2x128xf32>
    %298 = vector.extract_strided_slice %10 {offsets = [14, 0], sizes = [2, 128], strides = [1, 1]} : vector<16x256xf32> to vector<2x128xf32>
    %299 = arith.addf %297, %298 : vector<2x128xf32>
    %300 = vector.extract_strided_slice %296 {offsets = [0, 128], sizes = [2, 128], strides = [1, 1]} : vector<2x256xf32> to vector<2x128xf32>
    %301 = vector.extract_strided_slice %10 {offsets = [0, 128], sizes = [2, 128], strides = [1, 1]} : vector<16x256xf32> to vector<2x128xf32>
    %302 = arith.addf %300, %301 : vector<2x128xf32>
    %303 = vector.extract_strided_slice %299 {offsets = [0, 0], sizes = [2, 96], strides = [1, 1]} : vector<2x128xf32> to vector<2x96xf32>
    %304 = arith.negf %303 : vector<2x96xf32>
    %305 = math.exp %304 : vector<2x96xf32>
    %cst_36 = arith.constant 1.000000e+00 : f32
    %306 = vector.broadcast %cst_36 : f32 to vector<2x96xf32>
    %307 = arith.addf %306, %305 : vector<2x96xf32>
    %308 = arith.divf %306, %307 : vector<2x96xf32>
    %309 = vector.extract_strided_slice %302 {offsets = [0, 0], sizes = [2, 96], strides = [1, 1]} : vector<2x128xf32> to vector<2x96xf32>
    %310 = arith.negf %309 : vector<2x96xf32>
    %311 = math.exp %310 : vector<2x96xf32>
    %cst_37 = arith.constant 1.000000e+00 : f32
    %312 = vector.broadcast %cst_37 : f32 to vector<2x96xf32>
    %313 = arith.addf %312, %311 : vector<2x96xf32>
    %314 = arith.divf %312, %313 : vector<2x96xf32>
    %315 = vector.extract_strided_slice %299 {offsets = [0, 96], sizes = [2, 32], strides = [1, 1]} : vector<2x128xf32> to vector<2x32xf32>
    %316 = math.tanh %315 : vector<2x32xf32>
    %317 = vector.extract_strided_slice %302 {offsets = [0, 96], sizes = [2, 32], strides = [1, 1]} : vector<2x128xf32> to vector<2x32xf32>
    %318 = math.tanh %317 : vector<2x32xf32>
    %319 = vector.extract_strided_slice %308 {offsets = [0, 32], sizes = [2, 32], strides = [1, 1]} : vector<2x96xf32> to vector<2x32xf32>
    %320 = arith.mulf %319, %283 : vector<2x32xf32>
    %321 = vector.extract_strided_slice %308 {offsets = [0, 0], sizes = [2, 32], strides = [1, 1]} : vector<2x96xf32> to vector<2x32xf32>
    %322 = arith.mulf %321, %316 : vector<2x32xf32>
    %323 = arith.addf %320, %322 : vector<2x32xf32>
    %324 = vector.extract_strided_slice %314 {offsets = [0, 32], sizes = [2, 32], strides = [1, 1]} : vector<2x96xf32> to vector<2x32xf32>
    %325 = arith.mulf %324, %288 : vector<2x32xf32>
    %326 = vector.extract_strided_slice %314 {offsets = [0, 0], sizes = [2, 32], strides = [1, 1]} : vector<2x96xf32> to vector<2x32xf32>
    %327 = arith.mulf %326, %318 : vector<2x32xf32>
    %328 = arith.addf %325, %327 : vector<2x32xf32>
    %329 = vector.extract_strided_slice %308 {offsets = [0, 64], sizes = [2, 32], strides = [1, 1]} : vector<2x96xf32> to vector<2x32xf32>
    %330 = math.tanh %323 : vector<2x32xf32>
    %331 = arith.mulf %329, %330 : vector<2x32xf32>
    %332 = vector.extract_strided_slice %314 {offsets = [0, 64], sizes = [2, 32], strides = [1, 1]} : vector<2x96xf32> to vector<2x32xf32>
    %333 = math.tanh %328 : vector<2x32xf32>
    %334 = arith.mulf %332, %333 : vector<2x32xf32>
    %335 = tpu.concatenate %331, %334 in 1 : vector<2x32xf32>, vector<2x32xf32> -> vector<2x64xf32>
    %336 = vector.extract_strided_slice %335 {offsets = [0, 0], sizes = [2, 32], strides = [1, 1]} : vector<2x64xf32> to vector<2x32xf32>
    %c0_38 = arith.constant 0 : index
    %c0_39 = arith.constant 0 : index
    %c0_40 = arith.constant 0 : index
    %337 = vector.load %arg5[%c0_38, %c0_39, %c0_40] : memref<2x2x32xf32, #tpu.memory_space<vmem>>, vector<1x2x32xf32>
    %338 = vector.shape_cast %337 : vector<1x2x32xf32> to vector<2x32xf32>
    %339 = vector.shape_cast %336 : vector<2x32xf32> to vector<1x2x32xf32>
    tpu.vector_store %arg5[%c0_38, %c0_39, %c0_40], %339 {strides = array<i32>} : memref<2x2x32xf32, #tpu.memory_space<vmem>>, vector<1x2x32xf32>,
    %340 = vector.extract_strided_slice %335 {offsets = [0, 32], sizes = [2, 32], strides = [1, 1]} : vector<2x64xf32> to vector<2x32xf32>
    %c1 = arith.constant 1 : index
    %c0_41 = arith.constant 0 : index
    %c0_42 = arith.constant 0 : index
    %341 = vector.load %arg5[%c1, %c0_41, %c0_42] : memref<2x2x32xf32, #tpu.memory_space<vmem>>, vector<1x2x32xf32>
    %342 = vector.shape_cast %341 : vector<1x2x32xf32> to vector<2x32xf32>
    %343 = vector.shape_cast %340 : vector<2x32xf32> to vector<1x2x32xf32>
    tpu.vector_store %arg5[%c1, %c0_41, %c0_42], %343 {strides = array<i32>} : memref<2x2x32xf32, #tpu.memory_space<vmem>>, vector<1x2x32xf32>,
    %c0_43 = arith.constant 0 : index
    %c0_44 = arith.constant 0 : index
    %c0_45 = arith.constant 0 : index
    %344 = vector.load %arg6[%c0_43, %c0_44, %c0_45] : memref<2x2x32xf32, #tpu.memory_space<vmem>>, vector<1x2x32xf32>
    %345 = vector.shape_cast %344 : vector<1x2x32xf32> to vector<2x32xf32>
    %346 = vector.shape_cast %323 : vector<2x32xf32> to vector<1x2x32xf32>
    tpu.vector_store %arg6[%c0_43, %c0_44, %c0_45], %346 {strides = array<i32>} : memref<2x2x32xf32, #tpu.memory_space<vmem>>, vector<1x2x32xf32>,
    %c1_46 = arith.constant 1 : index
    %c0_47 = arith.constant 0 : index
    %c0_48 = arith.constant 0 : index
    %347 = vector.load %arg6[%c1_46, %c0_47, %c0_48] : memref<2x2x32xf32, #tpu.memory_space<vmem>>, vector<1x2x32xf32>
    %348 = vector.shape_cast %347 : vector<1x2x32xf32> to vector<2x32xf32>
    %349 = vector.shape_cast %328 : vector<2x32xf32> to vector<1x2x32xf32>
    tpu.vector_store %arg6[%c1_46, %c0_47, %c0_48], %349 {strides = array<i32>} : memref<2x2x32xf32, #tpu.memory_space<vmem>>, vector<1x2x32xf32>,
    %350 = tpu.concatenate %51, %334 in 1 : vector<2x32xf32>, vector<2x32xf32> -> vector<2x64xf32>
    %351 = tpu.concatenate %91, %294 in 1 : vector<2x32xf32>, vector<2x32xf32> -> vector<2x64xf32>
    %352 = tpu.concatenate %131, %254 in 1 : vector<2x32xf32>, vector<2x32xf32> -> vector<2x64xf32>
    %353 = tpu.concatenate %171, %214 in 1 : vector<2x32xf32>, vector<2x32xf32> -> vector<2x64xf32>
    %354 = tpu.concatenate %211, %174 in 1 : vector<2x32xf32>, vector<2x32xf32> -> vector<2x64xf32>
    %355 = tpu.concatenate %251, %134 in 1 : vector<2x32xf32>, vector<2x32xf32> -> vector<2x64xf32>
    %356 = tpu.concatenate %291, %94 in 1 : vector<2x32xf32>, vector<2x32xf32> -> vector<2x64xf32>
    %357 = tpu.concatenate %331, %54 in 1 : vector<2x32xf32>, vector<2x32xf32> -> vector<2x64xf32>
    %358 = tpu.concatenate %350, %351, %352, %353, %354, %355, %356, %357 in 0 : vector<2x64xf32>, vector<2x64xf32>, vector<2x64xf32>, vector<2x64xf32>, vector<2x64xf32>, vector<2x64xf32>, vector<2x64xf32>, vector<2x64xf32> -> vector<16x64xf32>
    %c0_49 = arith.constant 0 : index
    %c0_50 = arith.constant 0 : index
    %359 = vector.load %arg7[%c0_49, %c0_50] : memref<16x64xf32, #tpu.memory_space<vmem>>, vector<16x64xf32>
    tpu.vector_store %arg7[%c0_49, %c0_50], %358 {strides = array<i32>} : memref<16x64xf32, #tpu.memory_space<vmem>>, vector<16x64xf32>,
    return
  }
  func.func @transform_0(%arg0: i32) -> (i32, i32) {
    %c0_i32 = arith.constant 0 : i32
    %c0_i32_0 = arith.constant 0 : i32
    %c0_i32_1 = arith.constant 0 : i32
    return %c0_i32, %c0_i32_0 : i32, i32
  }
  func.func @transform_1(%arg0: i32) -> (i32, i32, i32) {
    %c0_i32 = arith.constant 0 : i32
    %c0_i32_0 = arith.constant 0 : i32
    %c0_i32_1 = arith.constant 0 : i32
    return %arg0, %c0_i32, %c0_i32_0 : i32, i32, i32
  }
  func.func @transform_2(%arg0: i32) -> (i32, i32, i32) {
    %c0_i32 = arith.constant 0 : i32
    %c0_i32_0 = arith.constant 0 : i32
    %c0_i32_1 = arith.constant 0 : i32
    return %arg0, %c0_i32, %c0_i32_0 : i32, i32, i32
  }
  func.func @transform_3(%arg0: i32) -> (i32, i32, i32) {
    %c0_i32 = arith.constant 0 : i32
    %c0_i32_0 = arith.constant 0 : i32
    %c0_i32_1 = arith.constant 0 : i32
    return %arg0, %c0_i32, %c0_i32_0 : i32, i32, i32
  }
  func.func @transform_4(%arg0: i32) -> (i32, i32, i32) {
    %c0_i32 = arith.constant 0 : i32
    %c0_i32_0 = arith.constant 0 : i32
    %c0_i32_1 = arith.constant 0 : i32
    return %arg0, %c0_i32, %c0_i32_0 : i32, i32, i32
  }
  func.func @transform_5(%arg0: i32) -> (i32, i32, i32) {
    %c0_i32 = arith.constant 0 : i32
    %c0_i32_0 = arith.constant 0 : i32
    %c0_i32_1 = arith.constant 0 : i32
    return %arg0, %c0_i32, %c0_i32_0 : i32, i32, i32
  }
}

</mosaic_0001>

<bundles_post_ra>
// kernel: tpu_custom_call.1
= control target key start
LH: loop header
LB: loop body
LE: loop exit
PB: predicated region body
PF: predicated region fallthrough
CT: control target
= control target key end

     0   :  { %s3018_s0 = inlined_call_operand.hbm [shape: f32[16,64], index: 0, kind: input, shape index: {}]   ;;  %s3019_s1 = inlined_call_operand.hbm [shape: f32[2,64,256], index: 1, kind: input, shape index: {}]   ;;  %s3020_s2 = inlined_call_operand.hbm [shape: f32[2,64,256], index: 2, kind: input, shape index: {}]   ;;  %s3021_s3 = inlined_call_operand.hbm [shape: f32[2,1,256], index: 3, kind: input, shape index: {}]   ;;  %s3022_s4 = inlined_call_operand.hbm [shape: f32[4,2,32], index: 4, kind: output, shape index: {0}]   ;;  %s3023_s5 = inlined_call_operand.hbm [shape: f32[4,2,32], index: 5, kind: output, shape index: {1}]  }
   0x1   :  { %3033 = sst [smem:[#allocation24_spill]] %s3018_s0 }
   0x2   :  { %3034 = sst [smem:[#allocation25_spill]] %s3019_s1 }
   0x3   :  { %3035 = sst [smem:[#allocation26_spill]] %s3020_s2 }
   0x4   :  { %3036 = sst [smem:[#allocation27_spill]] %s3022_s4 }
   0x5   :  { %11 = vsyncpa [#allocation4], 0 }
   0x6   :  { %12 = vsyncpa [#allocation7], 0 }
   0x7   :  { %14 = vsyncpa [#allocation7 + $0x1], 0 }
   0x8   :  { %15 = vsyncpa [#allocation10], 0 }
   0x9   :  { %17 = vsyncpa [#allocation10 + $0x1], 0 }
   0xa   :  { %18 = vsyncpa [#allocation5], 0 }
   0xb   :  { %20 = vsyncpa [#allocation5 + $0x1], 0 }
   0xc   :  { %21 = vsyncpa [#allocation13], 0 }
   0xd   :  { %23 = vsyncpa [#allocation13 + $0x1], 0  ;;  %s2308_s18 = smov 0   ;;  %s2310_s19 = smov 0  }
   0xe   :  { %s2312_s20 = smov 0   ;;  %s2314_s21 = smov 0  }
   0xf LB: > { %3037 = sst [smem:[#allocation19_spill]] %s2254_s18  ;;  %s2329_s22 = sadd.s32 1, %s2266_s21   ;;  %s2266_s21 = sphi %s2314_s21, %s3060_s21   ;;  %s2262_s20 = sphi %s2312_s20, %s3062_s20   ;;  %s2258_s19 = sphi %s2310_s19, %s3064_s19   ;;  %s2254_s18 = sphi %s2308_s18, %s3063_s18  }
  0x10   : > { %3038 = sst [smem:[#allocation20_spill]] %s2262_s20  ;;  %s57_s23 = sadd.s32 1, %s2262_s20 }
  0x11   : > { %3039 = sst [smem:[#allocation21_spill]] %s2329_s22  ;;  %s54_s24 = ssub.s32 %s2266_s21, %s2329_s22 }
  0x12   : > { %p64_p0 = scmp.ne.s32.totalorder %s2262_s20, %s2258_s19  ;;  %p55_p1 = scmp.eq.s32.totalorder %s54_s24, 0 }
  0x13   : > { %p65_p2 = scmp.eq.s32.totalorder %s2266_s21, 0  ;;  %p1867_p4 = scmp.lt.s32.totalorder %s2266_s21, 2 }
  0x14   : > { %s2340_s25 = scalar_select %p55_p1, %s2262_s20, %s57_s23  }
  0x15   : > { %p66_p5 = por %p65_p2, %p64_p0  ;;  %s212_s26 = sand.u32 1, %s2266_s21  }
  0x16   : > { %3040 = sst [smem:[#allocation22_spill]] %s2340_s25  ;;  %s2347_s27 = sand.u32 1, %s2262_s20  }
  0x17   : > { %s1767_s28 = sshll.u32 %s2347_s27, 7  ;;  %s1827_s29 = sshll.u32 %s2266_s21, 7 }
  0x18   : > { %s3041_s1 = sld [smem:[#allocation25_spill]]  ;;  %s216_s9 = scalar_lea.vmem [#allocation6], %s1767_s28 }
  0x19   : > { %s224_s10 = sshll.u32 %s216_s9, 4  ;;  %p2358_p6 = pnand %p1867_p4, %p66_p5  ;;  %s225_s10 = int_to_ptr.vmem [resolvable:$true] %s224_s10 }
  0x1a   : > { %s3043_s2 = sld [smem:[#allocation26_spill]]  ;;  %s2365_s15 = scalar_lea.sflag [#allocation7], %s212_s26 }
  0x1b   : > { %p2044_p8 = pneg %p2358_p6 }
  0x1e   : > { %s221_s7 = scalar_lea.hbm %s3041_s1, %s1827_s29  ;;  %s2047_s30 = scalar_lea.hbm %s3041_s1, 256 }
  0x1f   : > { %s222_s8 = sshll.u32 %s221_s7, 4  ;;  %s223_s8 = int_to_ptr.hbm [resolvable:$true] %s222_s8 }
  0x20   : > { %s243_s14 = scalar_lea.hbm %s3043_s2, %s1827_s29  ;;  %s2040_s16 = sshra.s32 %s223_s8, 4  ;;  %s2041_s16 = int_to_ptr.hbm [resolvable:$true] %s2040_s16 }
  0x21   : > { %s2042_s17 = scalar_lea.hbm %s2041_s16, 128  ;;  %p2048_p11 = scmp.lt.s32.totalorder %s2041_s16, %s3041_s1 }
  0x22   : > { %p2043_p7 = scmp.ne.s32.totalorder %s2041_s16, %s2042_s17  ;;  %p2049_p12 = scmp.lt.s32.totalorder %s2047_s30, %s2042_s17 }
  0x24   : > { %p2045_p9 = pnand %p2044_p8, %p2043_p7  ;;  %p2050_p13 = por %p2049_p12, %p2048_p11 }
  0x26   : > { %p2046_p10 = pneg %p2045_p9 }
  0x28   : > { %p2051_p1 = pnand %p2050_p13, %p2046_p10 }
  0x2a   : > { %2054 = shalt.err (!%p2051_p1)
}
  0x2b   : > { %s3024_s26 = smov 256   ;;  %s3025_s29 = smov 16  }
  0x2c   : > { %1852 = dma.hbm_to_vmem [thread:$0]  (!%p2358_p6), %s223_s8, 2048, %s225_s10, %s2365_s15, %s3024_s26, %s3024_s26, %s3025_s29  }
  0x2d   : > { %s244_s9 = sshll.u32 %s243_s14, 4  ;;  %s238_s12 = scalar_lea.vmem [#allocation8], %s1767_s28  ;;  %s2386_s9 = int_to_ptr.hbm [resolvable:$true] %s244_s9 }
  0x2e   : > { %s246_s13 = sshll.u32 %s238_s12, 4  ;;  %s2391_s16 = sadd.s32 4294967295, %s2266_s21   ;;  %s2388_s13 = int_to_ptr.vmem [resolvable:$true] %s246_s13 }
  0x2f   : > { %s1763_s17 = sadd.s32 4294967294, %s2266_s21   ;;  %p70_p2 = scmp.ne.s32.totalorder %s2258_s19, %s2254_s18 }
  0x30   : > { %p3026_p4 = scmp.eq.s32.totalorder %s2391_s16, 0  ;;  %p146_p5 = scmp.eq.s32.totalorder %s2391_s16, 1 }
  0x31   : > { %p152_p7 = scmp.eq.s32.totalorder %s1763_s17, 1  ;;  %p1764_p10 = scmp.ge.s32.totalorder %s2266_s21, 1 }
  0x32   : > { %p2400_p9 = por %p3026_p4, %p70_p2  ;;  %p2408_p11 = por %p146_p5, %p64_p0 }
  0x33   : > { %p2412_p12 = por %p152_p7, %p70_p2  ;;  %p185_p13 = scmp.lt.s32.totalorder %s2266_s21, 3 }
  0x34   : > { %s3048_s0 = sld [smem:[#allocation24_spill]]  ;;  %s2270_s6 = smov [#allocation3]  }
  0x35   : > { %s3046_s10 = scalar_select %p2412_p12, 1, 0 }
  0x36   : > { %p2421_p3 = pnand %p1764_p10, %p185_p13  ;;  %s198_s7 = sshll.u32 %s2270_s6, 4  ;;  %s199_s7 = int_to_ptr.vmem [resolvable:$true] %s198_s7 }
  0x37   : > { %3047 = sst [smem:[#allocation23_spill]] %s3046_s10  ;;  %s1773_s17 = sshll.u32 %s2347_s27, 1 }
  0x38   : > { %p1845_p0 = pneg %p2421_p3  ;;  %s2070_s26 = sshra.s32 %s2386_s9, 4  ;;  %s2071_s26 = int_to_ptr.hbm [resolvable:$true] %s2070_s26 }
  0x39   : > { %s2072_s14 = scalar_lea.hbm %s2071_s26, 128  ;;  %s2077_s6 = scalar_lea.hbm %s3043_s2, 256 }
  0x3a   : > { %s196_s24 = sshll.u32 %s3048_s0, 4  ;;  %p2429_p2 = pnand %p1845_p0, %p3026_p4  ;;  %s197_s24 = int_to_ptr.hbm [resolvable:$true] %s196_s24 }
  0x3b   : > { %p2073_p5 = scmp.ne.s32.totalorder %s2071_s26, %s2072_s14  ;;  %p2078_p13 = scmp.lt.s32.totalorder %s2071_s26, %s3043_s2 }
  0x3c   : > { %p2079_p0 = scmp.lt.s32.totalorder %s2077_s6, %s2072_s14 }
  0x3d   : > { %p2075_p7 = pnand %p2073_p5, %p2044_p8 }
  0x3e   : > { %p2080_p1 = por %p2079_p0, %p2078_p13 }
  0x3f   : > { %p2076_p10 = pneg %p2075_p7 }
  0x41   : > { %p2081_p4 = pnand %p2080_p1, %p2076_p10 }
  0x43   : > { %2084 = shalt.err (!%p2081_p4)
}
  0x44   : > { %s3051_s25 = smov 16   ;;  %s3052_s20 = smov 256  }
  0x45   : > { %1855 = dma.hbm_to_vmem [thread:$0]  (!%p2358_p6), %s2386_s9, 2048, %s2388_s13, %s2365_s15, %s3052_s20, %s3052_s20, %s3051_s25  }
  0x46   : > { %s2271_s29 = smov 128   ;;  %s2272_s0 = smov 8  }
  0x47   : > { %1848 = dma.hbm_to_vmem [thread:$0]  (!%p2429_p2), %s197_s24, 256, %s199_s7, [#allocation4], %s2271_s29, %s2271_s29, %s2272_s0  }
  0x48   : > { %s1774_s1 = sshll.u32 %s2266_s21, 1  ;;  %s260_s26 = scalar_lea.vmem [#allocation9], %s1773_s17 }
  0x49   : > { %s268_s14 = sshll.u32 %s260_s26, 4  ;;  %s264_s2 = scalar_lea.hbm %s3021_s3, %s1774_s1  ;;  %s269_s14 = int_to_ptr.vmem [resolvable:$true] %s268_s14 }
  0x4a   : > { %s266_s22 = sshll.u32 %s264_s2, 4  ;;  %s257_s10 = scalar_lea.sflag [#allocation10], %s2347_s27  ;;  %s267_s22 = int_to_ptr.hbm [resolvable:$true] %s266_s22 }
  0x4b   : > { %s2130_s18 = sshra.s32 %s267_s22, 4  ;;  %s2137_s15 = scalar_lea.hbm %s3021_s3, 4  ;;  %s2131_s18 = int_to_ptr.hbm [resolvable:$true] %s2130_s18 }
  0x4c   : > { %s2132_s4 = scalar_lea.hbm %s2131_s18, 2  ;;  %p2138_p2 = scmp.lt.s32.totalorder %s2131_s18, %s3021_s3 }
  0x4d   : > { %p2133_p4 = scmp.ne.s32.totalorder %s2131_s18, %s2132_s4  ;;  %p2139_p7 = scmp.lt.s32.totalorder %s2137_s15, %s2132_s4 }
  0x4f   : > { %p2135_p1 = pnand %p2133_p4, %p2044_p8  ;;  %p2140_p10 = por %p2139_p7, %p2138_p2 }
  0x51   : > { %p2136_p5 = pneg %p2135_p1 }
  0x53   : > { %p2141_p13 = pnand %p2140_p10, %p2136_p5 }
  0x55   : > { %2144 = shalt.err (!%p2141_p13)
}
  0x56   : > { %1858 = dma.hbm_to_vmem [thread:$0]  (!%p2358_p6), %s267_s22, 32, %s269_s14, %s257_s10  }
  0x57   : > { %277 = sbr.rel (%p2421_p3) target bundleno = 4961 (0x1361), region = 36  ;;  %p3053_p8 = scmp.eq.s32.totalorder (!%p2421_p3), %s2391_s16, 0 }
  0x5c   : > { %2233 = dma.done.wait (%p3053_p8), [#allocation4], 256   ;;  %p3054_p0 = pmov %p3053_p8 }
  0x5d   : > { %s284_s2 = sand.u32 1, %s2391_s16   ;;  %s2478_s4 = sand.u32 1, %s2258_s19  }
  0x5e   : > { %2235 = vsyncadd (%p3054_p0), [#allocation4], 4294967040  ;;  %s1777_s18 = sshll.u32 %s2478_s4, 7  ;;  %s285_s27 = scalar_lea.sflag [#allocation7], %s284_s2 }
  0x5f   : > { %s2481_s11 = scalar_lea.vmem [#allocation6], %s1777_s18 }
  0x60   : > { %2237 = dma.done.wait (%p2400_p9), %s285_s27, 4096  }
  0x61   : > { %2239 = vsyncadd (%p2400_p9), %s285_s27, 4294963200  ;;  %s1779_s22 = sshll.u32 %s2478_s4, 1  ;;  %s2488_s10 = scalar_lea.vmem [#allocation8], %s1777_s18 }
  0x62   : > { %s305_s24 = scalar_lea.sflag [#allocation10], %s2478_s4  ;;  %s2491_s30 = scalar_lea.vmem [#allocation9], %s1779_s22 }
  0x63   : > { %2241 = dma.done.wait (%p2400_p9), %s305_s24, 32  }
  0x64   : > { %2243 = vsyncadd (%p2400_p9), %s305_s24, 4294967264  ;;  %s1780_s7 = sshll.u32 %s2478_s4, 2  ;;  %p3055_p3 = scmp.ne.s32.totalorder %s2391_s16, 0 }
  0x65   : > { %s2498_s12 = scalar_lea.vmem [#allocation11], %s1780_s7  ;;  %s2500_s17 = scalar_lea.vmem [#allocation12], %s1780_s7 }
  0x66   : > { %356 = sbr.rel (%p3055_p3) target bundleno = 110 (0x6e), region = 56 }
  0x6b   : > { %v357_v0 = vld [vmem:[#allocation3] sm:$0xff]  ;;  %vm359_vm0 = vcmask 523264   ;;  %v358_v1 = vld [vmem:[#allocation3 + $0x8] sm:$0xff] }
  0x6c   : > { %360 = vst.msk [vmem:[#allocation2] sm:$0xff] %vm359_vm0, %v357_v0 }
  0x6d   : > { %361 = vst.msk [vmem:[#allocation2 + $0x8] sm:$0xff] %vm359_vm0, %v358_v1 }
  0x6e PF: > { %v379_v2 = vld [vmem:[%s2481_s11 + $0x78] sm:$0xff]  ;;  %v2506_v3 = vld [vmem:[%s2488_s10 + $0x70] sm:$0xff]  ;;  %v377_v4 = vld [vmem:[%s2481_s11 + $0x68] sm:$0xff]  ;;  %vm386_vm1 = vcmask 523264   ;;  %v2273_v34 = vmov 0.0   ;;  %s2274_s28 = smov 32  }
  0x6f   : > { %424 = vmatpush.msra.mxu1 %v379_v2  ;;  %466 = vmatpush.msra.mxu2 %v2506_v3  ;;  %v2511_v5 = vld [vmem:[%s2488_s10 + $0x60] sm:$0xff]  ;;  %v378_v6 = vld [vmem:[%s2481_s11 + $0x70] sm:$0xff]  ;;  %v375_v7 = vld [vmem:[%s2481_s11 + $0x58] sm:$0xff]  ;;  %s2275_s29 = smov 64   ;;  %s2276_s0 = smov 96   ;;  %vm585_vm10 = vcmask 261120  }
  0x70   : > { %401 = vmatpush.msra.mxu0 %v378_v6  ;;  %v2516_v8 = vld [vmem:[%s2488_s10 + $0x50] sm:$0xff]  ;;  %v376_v9 = vld [vmem:[%s2481_s11 + $0x60] sm:$0xff]  ;;  %v2521_v10 = vld [vmem:[%s2488_s10 + $0x78] sm:$0xff]  ;;  %s1829_s1 = sshll.u32 %s2391_s16, 2  ;;  %s1599_s6 = sshll.u32 %s2500_s17, 4  ;;  %s1600_s6 = int_to_ptr.vmem [resolvable:$true] %s1599_s6 }
  0x71   : > { %425 = vmatpush.msra.mxu1 %v377_v4  ;;  %467 = vmatpush.msra.mxu2 %v2511_v5  ;;  %v374_v11 = vld [vmem:[%s2481_s11 + $0x50] sm:$0xff]  ;;  %v373_v12 = vld [vmem:[%s2481_s11 + $0x48] sm:$0xff]  ;;  %v2526_v13 = vld [vmem:[%s2488_s10 + $0x40] sm:$0xff]  ;;  %s1598_s23 = scalar_lea.hbm %s3023_s5, %s1829_s1  ;;  %s1570_s25 = scalar_lea.sflag [#allocation13], %s2478_s4 }
  0x72   : > { %402 = vmatpush.msra.mxu0 %v376_v9  ;;  %486 = vmatpush.msra.mxu3 %v2521_v10  ;;  %v2530_v14 = vld [vmem:[%s2488_s10 + $0x68] sm:$0xff]  ;;  %v372_v15 = vld [vmem:[%s2481_s11 + $0x40] sm:$0xff]  ;;  %v371_v16 = vld [vmem:[%s2481_s11 + $0x38] sm:$0xff]  ;;  %s1601_s20 = sshll.u32 %s1598_s23, 4  ;;  %s2180_s18 = scalar_lea.hbm %s3023_s5, 8  ;;  %s1602_s20 = int_to_ptr.hbm [resolvable:$true] %s1601_s20 }
  0x73   : > { %426 = vmatpush.msra.mxu1 %v375_v7  ;;  %468 = vmatpush.msra.mxu2 %v2516_v8  ;;  %v2536_v17 = vld [vmem:[%s2488_s10 + $0x30] sm:$0xff]  ;;  %v2540_v18 = vld [vmem:[%s2488_s10 + $0x58] sm:$0xff]  ;;  %v2545_v20 = vld [vmem:[%s2488_s10 + $0x48] sm:$0xff]  ;;  %s2174_s15 = sshra.s32 %s1602_s20, 4  ;;  %s2175_s15 = int_to_ptr.hbm [resolvable:$true] %s2174_s15 }
  0x74   : > { %403 = vmatpush.msra.mxu0 %v374_v11  ;;  %487 = vmatpush.msra.mxu3 %v2530_v14  ;;  %v370_v19 = vld [vmem:[%s2481_s11 + $0x30] sm:$0xff]  ;;  %v369_v21 = vld [vmem:[%s2481_s11 + $0x28] sm:$0xff]  ;;  %v2549_v22 = vld [vmem:[%s2488_s10 + $0x20] sm:$0xff]  ;;  %s2176_s9 = scalar_lea.hbm %s2175_s15, 4  ;;  %p2181_p1 = scmp.lt.s32.totalorder %s2175_s15, %s3023_s5 }
  0x75   : > { %427 = vmatpush.msra.mxu1 %v373_v12  ;;  %469 = vmatpush.msra.mxu2 %v2526_v13  ;;  %v368_v23 = vld [vmem:[%s2481_s11 + $0x20] sm:$0xff]  ;;  %v2555_v24 = vld [vmem:[%s2488_s10 + $0x38] sm:$0xff]  ;;  %v2559_v26 = vld [vmem:[%s2488_s10 + $0x10] sm:$0xff]  ;;  %p2177_p6 = scmp.ne.s32.totalorder %s2175_s15, %s2176_s9  ;;  %p2182_p5 = scmp.lt.s32.totalorder %s2180_s18, %s2176_s9 }
  0x76   : > { %404 = vmatpush.msra.mxu0 %v372_v15  ;;  %488 = vmatpush.msra.mxu3 %v2540_v18  ;;  %v367_v25 = vld [vmem:[%s2481_s11 + $0x18] sm:$0xff]  ;;  %v366_v27 = vld [vmem:[%s2481_s11 + $0x10] sm:$0xff]  ;;  %v2565_v28 = vld [vmem:[%s2488_s10 + $0x28] sm:$0xff] }
  0x77   : > { %428 = vmatpush.msra.mxu1 %v371_v16  ;;  %470 = vmatpush.msra.mxu2 %v2536_v17  ;;  %v365_v29 = vld [vmem:[%s2481_s11 + $0x8] sm:$0xff]  ;;  %v2569_v30 = vld [vmem:[%s2488_s10] sm:$0xff]  ;;  %v2576_v33 = vld [vmem:[%s2488_s10 + $0x18] sm:$0xff]  ;;  %p2178_p9 = pnand %p2177_p6, %p2408_p11  ;;  %p2183_p2 = por %p2182_p5, %p2181_p1 }
  0x78   : > { %405 = vmatpush.msra.mxu0 %v370_v19  ;;  %489 = vmatpush.msra.mxu3 %v2545_v20  ;;  %v362_v31 = vld [vmem:[#allocation2] sm:$0xff]  ;;  %v2581_v35 = vld [vmem:[%s2488_s10 + $0x8] sm:$0xff] }
  0x79   : > { %429 = vmatpush.msra.mxu1 %v369_v21  ;;  %471 = vmatpush.msra.mxu2 %v2549_v22  ;;  %v364_v32 = vld [vmem:[%s2481_s11] sm:$0xff]  ;;  %v363_v36 = vld [vmem:[#allocation2 + $0x8] sm:$0xff]  ;;  %p2179_p4 = pneg %p2178_p9 }
  0x7a   : > { %406 = vmatpush.msra.mxu0 %v368_v23  ;;  %490 = vmatpush.msra.mxu3 %v2555_v24  ;;  %v2653_v37 = vld [vmem:[%s2491_s30] sm:$0x3] }
  0x7b   : > { %430 = vmatpush.msra.mxu1 %v367_v25  ;;  %472 = vmatpush.msra.mxu2 %v2559_v26  ;;  %v383_v38 = vperm.slane %v2653_v37, 1  ;;  %v382_v39 = vperm.slane %v2653_v37, 0  ;;  %p2184_p7 = pnand %p2183_p2, %p2179_p4 }
  0x7c   : > { %407 = vmatpush.msra.mxu0 %v366_v27  ;;  %491 = vmatpush.msra.mxu3 %v2565_v28 }
  0x7d   : > { %431 = vmatpush.msra.mxu1 %v365_v29  ;;  %473 = vmatpush.msra.mxu2 %v2569_v30 }
  0x7e   : > { %1785 = vmatmul.msk.f32.vlgmr.msra.gmra.mxu1 %vm386_vm1, %v362_v31  ;;  %474 = vmatmul.f32.vlgmr.msra.gmra.mxu2 %v2273_v34 }
  0x7f   : > { %408 = vmatpush.msra.mxu0 %v364_v32  ;;  %492 = vmatpush.msra.mxu3 %v2576_v33 }
  0x80   : > { %1783 = vmatmul.msk.f32.vlgmr.msra.gmra.mxu0 %vm386_vm1, %v362_v31  ;;  %618 = vmatpush.msrb.mxu1 %v2521_v10 }
  0x81   : > { %493 = vmatpush.msra.mxu3 %v2581_v35  ;;  %598 = vmatpush.msrb.mxu0 %v2506_v3 }
  0x82   : > { %494 = vmatmul.f32.vlgmr.msra.gmra.mxu3 %v2273_v34  ;;  %619 = vmatpush.msrb.mxu1 %v2530_v14 }
  0x83   : > { %599 = vmatpush.msrb.mxu0 %v2511_v5  ;;  %731 = vmatpush.msrb.mxu2 %v2506_v3 }
  0x84   : > { %620 = vmatpush.msrb.mxu1 %v2540_v18  ;;  %751 = vmatpush.msrb.mxu3 %v2521_v10 }
  0x85   : > { %600 = vmatpush.msrb.mxu0 %v2516_v8  ;;  %732 = vmatpush.msrb.mxu2 %v2511_v5 }
  0x86   : > { %1786 = vmatmul.msk.f32.gmra.mxu1 %vm386_vm1, %v363_v36  ;;  %752 = vmatpush.msrb.mxu3 %v2530_v14 }
  0x87   : > { %621 = vmatpush.msrb.mxu1 %v2545_v20  ;;  %601 = vmatpush.msrb.mxu0 %v2526_v13 }
  0x88   : > { %1784 = vmatmul.msk.f32.gmra.mxu0 %vm386_vm1, %v363_v36  ;;  %733 = vmatpush.msrb.mxu2 %v2516_v8 }
  0x89   : > { %622 = vmatpush.msrb.mxu1 %v2555_v24  ;;  %602 = vmatpush.msrb.mxu0 %v2536_v17 }
  0x8a   : > { %753 = vmatpush.msrb.mxu3 %v2540_v18  ;;  %734 = vmatpush.msrb.mxu2 %v2526_v13 }
  0x8b   : > { %623 = vmatpush.msrb.mxu1 %v2565_v28  ;;  %603 = vmatpush.msrb.mxu0 %v2549_v22 }
  0x8c   : > { %754 = vmatpush.msrb.mxu3 %v2545_v20  ;;  %735 = vmatpush.msrb.mxu2 %v2536_v17 }
  0x8d   : > { %624 = vmatpush.msrb.mxu1 %v2576_v33  ;;  %604 = vmatpush.msrb.mxu0 %v2559_v26 }
  0x8e   : > { %755 = vmatpush.msrb.mxu3 %v2555_v24  ;;  %736 = vmatpush.msrb.mxu2 %v2549_v22 }
  0x8f   : > { %625 = vmatpush.msrb.mxu1 %v2581_v35  ;;  %605 = vmatpush.msrb.mxu0 %v2569_v30 }
  0x90   : > { %756 = vmatpush.msrb.mxu3 %v2565_v28  ;;  %737 = vmatpush.msrb.mxu2 %v2559_v26 }
  0x91   : > { %863 = vmatpush.msra.mxu0 %v2506_v3  ;;  %883 = vmatpush.msra.mxu1 %v2521_v10 }
  0x92   : > { %757 = vmatpush.msrb.mxu3 %v2576_v33  ;;  %738 = vmatpush.msrb.mxu2 %v2569_v30 }
  0x93   : > { %864 = vmatpush.msra.mxu0 %v2511_v5  ;;  %884 = vmatpush.msra.mxu1 %v2530_v14 }
  0x94   : > { %758 = vmatpush.msrb.mxu3 %v2581_v35  ;;  %993 = vmatpush.msra.mxu2 %v2506_v3 }
  0x95   : > { %865 = vmatpush.msra.mxu0 %v2516_v8  ;;  %885 = vmatpush.msra.mxu1 %v2540_v18 }
  0x96   : > { %1013 = vmatpush.msra.mxu3 %v2521_v10  ;;  %994 = vmatpush.msra.mxu2 %v2511_v5 }
  0x97   : > { %866 = vmatpush.msra.mxu0 %v2526_v13  ;;  %886 = vmatpush.msra.mxu1 %v2545_v20 }
  0x98   : > { %1014 = vmatpush.msra.mxu3 %v2530_v14  ;;  %995 = vmatpush.msra.mxu2 %v2516_v8 }
  0x99   : > { %867 = vmatpush.msra.mxu0 %v2536_v17  ;;  %887 = vmatpush.msra.mxu1 %v2555_v24 }
  0x9a   : > { %1015 = vmatpush.msra.mxu3 %v2540_v18  ;;  %996 = vmatpush.msra.mxu2 %v2526_v13 }
  0x9b   : > { %868 = vmatpush.msra.mxu0 %v2549_v22  ;;  %888 = vmatpush.msra.mxu1 %v2565_v28 }
  0x9c   : > { %1016 = vmatpush.msra.mxu3 %v2545_v20  ;;  %997 = vmatpush.msra.mxu2 %v2536_v17 }
  0x9d   : > { %869 = vmatpush.msra.mxu0 %v2559_v26  ;;  %889 = vmatpush.msra.mxu1 %v2576_v33 }
  0x9e   : > { %1017 = vmatpush.msra.mxu3 %v2555_v24  ;;  %998 = vmatpush.msra.mxu2 %v2549_v22 }
  0x9f   : > { %870 = vmatpush.msra.mxu0 %v2569_v30  ;;  %890 = vmatpush.msra.mxu1 %v2581_v35 }
  0xa0   : > { %1018 = vmatpush.msra.mxu3 %v2565_v28  ;;  %999 = vmatpush.msra.mxu2 %v2559_v26 }
  0xa2   : > { %1019 = vmatpush.msra.mxu3 %v2576_v33  ;;  %1000 = vmatpush.msra.mxu2 %v2569_v30 }
  0xa4   : > { %1020 = vmatpush.msra.mxu3 %v2581_v35 }
  0xfb   : > { %v433_v40 = vpop.f32.mrf.mxu1 }
  0xfc   : > { %v2657_v41 = vadd.f32 %v433_v40, %v383_v38 }
  0xfd   : > { %v410_v42 = vpop.f32.mrf.mxu0 }
  0xfe   : > { %v2661_v43 = vadd.f32 %v410_v42, %v382_v39 }
 0x101   : > { %v475_v44 = vpop.f32.mrf.mxu2 }
 0x102   : > { %v498_v45 = vadd.f32 %v475_v44, %v2661_v43 }
 0x103   : > { %v436_v46 = vpop.f32.mrf.mxu1 }
 0x104   : > { %1912 = vtanh.f32 %v498_v45  ;;  %v2664_v47 = vadd.f32 %v436_v46, %v383_v38  ;;  %v1787_v53 = vmul.f32 -1.442695, %v498_v45 }
 0x105   : > { %v495_v48 = vpop.f32.mrf.mxu3 }
 0x106   : > { %v500_v49 = vrot.slane %v2664_v47, 6 }
 0x108   : > { %v502_v50 = vadd.f32 %v500_v49, %v495_v48 }
 0x10a   : > { %v1913_v51 = vpop.eup %1912  ;;  %1914 = vtanh.f32 %v502_v50  ;;  %v1788_v54 = vmul.f32 -1.442695, %v502_v50 }
 0x10b   : > { %545 = vrot.lane.b32.xlu0 %v1913_v51, %s2274_s28  ;;  %1916 = vpow2.f32 %v1787_v53 }
 0x10c   : > { %1918 = vpow2.f32 %v1788_v54 }
 0x110   : > { %v1915_v52 = vpop.eup %1914 }
 0x111   : > { %v1917_v55 = vpop.eup %1916 }
 0x112   : > { %v506_v56 = vadd.f32 1.0, %v1917_v55  ;;  %v1919_v57 = vpop.eup %1918  ;;  %v2706_v55 = vpop.f32.mrf.mxu0 }
 0x113   : > { %556 = vrot.lane.b32.xlu0 %v1915_v52, %s2274_s28  ;;  %v525_v58 = vadd.f32 1.0, %v1919_v57  ;;  %v634_v57 = vrot.slane %v2664_v47, 4 }
 0x114   : > { %1920 = vrcp.f32 %v506_v56  ;;  %v518_v4 = vand.u32 2147483648, %v506_v56  ;;  %vm512_vm3 = vweird.f32 %v506_v56  ;;  %v516_v6 = vand.u32 2147483647, %v506_v56 }
 0x115   : > { %1922 = vrcp.f32 %v525_v58  ;;  %v537_v21 = vand.u32 2147483648, %v525_v58  ;;  %vm531_vm7 = vweird.f32 %v525_v58  ;;  %v535_v23 = vand.u32 2147483647, %v525_v58 }
 0x116   : > { %v519_v11 = vor.u32 1.1754944e-38, %v518_v4  ;;  %vm517_vm5 = vcmp.eq.f32.partialorder %v516_v6, 8.507059e+37 }
 0x117   : > { %v538_v27 = vor.u32 1.1754944e-38, %v537_v21  ;;  %vm536_vm9 = vcmp.eq.f32.partialorder %v535_v23, 8.507059e+37 }
 0x11a   : > { %v1921_v59 = vpop.eup %1920 }
 0x11b   : > { %v508_v60 = vmul.f32 %v1921_v59, %v506_v56  ;;  %v1923_v62 = vpop.eup %1922  ;;  %vm513_vm2 = vweird.f32 %v1921_v59  ;;  %v631_v56 = vrot.slane %v2661_v43, 2 }
 0x11c   : > { %v527_v0 = vmul.f32 %v1923_v62, %v525_v58  ;;  %vm514_vm4 = vmor %vm512_vm3, %vm513_vm2  ;;  %vm532_vm6 = vweird.f32 %v1923_v62 }
 0x11d   : > { %v509_v61 = vsub.f32 1.0, %v508_v60  ;;  %vm533_vm8 = vmor %vm531_vm7, %vm532_vm6 }
 0x11e   : > { %v528_v2 = vsub.f32 1.0, %v527_v0 }
 0x11f   : > { %v510_v63 = vmul.f32 %v1921_v59, %v509_v61 }
 0x120   : > { %v529_v9 = vmul.f32 %v1923_v62, %v528_v2 }
 0x121   : > { %v511_v1 = vadd.f32 %v1921_v59, %v510_v63 }
 0x122   : > { %v530_v19 = vadd.f32 %v1923_v62, %v529_v9 }
 0x123   : > { %v515_v7 = vsel %vm514_vm4, %v1921_v59, %v511_v1 }
 0x124   : > { %v520_v15 = vsel %vm517_vm5, %v519_v11, %v515_v7  ;;  %v534_v25 = vsel %vm533_vm8, %v1923_v62, %v530_v19 }
 0x125   : > { %v539_v29 = vsel %vm536_vm9, %v538_v27, %v534_v25  ;;  %v543_v34 = vmul.f32 0.0, %v520_v15 }
 0x126   : > { %v554_v40 = vmul.f32 0.0, %v539_v29 }
 0x17d   : > { %v546_v12 = vpop.permute.xlu0 %545 }
 0x17e   : > { %v548_v16 = vmul.f32 %v546_v12, %v520_v15 }
 0x180   : > { %550 = vrot.lane.b32.xlu1 %v548_v16, %s2274_s28 }
 0x185   : > { %v557_v31 = vpop.permute.xlu0 %556 }
 0x186   : > { %v559_v32 = vmul.f32 %v557_v31, %v539_v29 }
 0x188   : > { %561 = vrot.lane.b32.xlu1 %v559_v32, %s2274_s28 }
 0x1f2   : > { %v551_v36 = vpop.permute.xlu1 %550 }
 0x1f3   : > { %v2671_v38 = vadd.f32 %v551_v36, %v543_v34 }
 0x1f5   : > { %1924 = vtanh.f32 %v2671_v38 }
 0x1fa   : > { %v562_v42 = vpop.permute.xlu1 %561 }
 0x1fb   : > { %v1925_v44 = vpop.eup %1924  ;;  %v2674_v45 = vadd.f32 %v562_v42, %v554_v40 }
 0x1fc   : > { %567 = vrot.lane.b32.xlu2 %v1925_v44, %s2274_s28 }
 0x1fd   : > { %1926 = vtanh.f32 %v2674_v45 }
 0x203   : > { %v1927_v46 = vpop.eup %1926 }
 0x204   : > { %573 = vrot.lane.b32.xlu2 %v1927_v46, %s2274_s28 }
 0x256   : > { %v568_v48 = vpop.permute.xlu2 %567 }
 0x257   : > { %v570_v49 = vmul.f32 %v568_v48, %v520_v15 }
 0x259   : > { %578 = vrot.lane.b32.xlu0 %v570_v49, %s2275_s29 }
 0x25e   : > { %v574_v50 = vpop.permute.xlu2 %573 }
 0x25f   : > { %v576_v51 = vmul.f32 %v574_v50, %v539_v29 }
 0x261   : > { %582 = vrot.lane.b32.xlu1 %v576_v51, %s2276_s0 }
 0x2cb   : > { %v2681_v52 = vpop.permute.xlu0 %578 }
 0x2d3   : > { %v2683_v53 = vpop.permute.xlu1 %582 }
 0x2d4   : > { %v586_v54 = vsel %vm585_vm10, %v2681_v52, %v2683_v53 }
 0x2d5   : > { %1789 = vmatmul.msk.f32.vlgmr.msrb.gmra.mxu0 %vm386_vm1, %v586_v54  ;;  %1790 = vmatmul.msk.f32.vlgmr.msrb.gmra.mxu1 %vm386_vm1, %v586_v54 }
 0x2d6   : > { %1124 = vmatpush.msrb.mxu0 %v2506_v3  ;;  %1144 = vmatpush.msrb.mxu1 %v2521_v10 }
 0x2d8   : > { %1125 = vmatpush.msrb.mxu0 %v2511_v5  ;;  %1145 = vmatpush.msrb.mxu1 %v2530_v14 }
 0x2da   : > { %1126 = vmatpush.msrb.mxu0 %v2516_v8  ;;  %1146 = vmatpush.msrb.mxu1 %v2540_v18 }
 0x2dc   : > { %1127 = vmatpush.msrb.mxu0 %v2526_v13  ;;  %1147 = vmatpush.msrb.mxu1 %v2545_v20 }
 0x2de   : > { %1128 = vmatpush.msrb.mxu0 %v2536_v17  ;;  %1148 = vmatpush.msrb.mxu1 %v2555_v24 }
 0x2e0   : > { %1129 = vmatpush.msrb.mxu0 %v2549_v22  ;;  %1149 = vmatpush.msrb.mxu1 %v2565_v28 }
 0x2e2   : > { %1130 = vmatpush.msrb.mxu0 %v2559_v26  ;;  %1150 = vmatpush.msrb.mxu1 %v2576_v33 }
 0x2e4   : > { %1131 = vmatpush.msrb.mxu0 %v2569_v30  ;;  %1151 = vmatpush.msrb.mxu1 %v2581_v35 }
 0x352   : > { %v607_v58 = vpop.f32.mrf.mxu0  ;;  %v627_v59 = vpop.f32.mrf.mxu1 }
 0x353   : > { %v633_v60 = vadd.f32 %v631_v56, %v607_v58  ;;  %v636_v61 = vadd.f32 %v634_v57, %v627_v59 }
 0x355   : > { %1928 = vtanh.f32 %v633_v60  ;;  %v1791_v0 = vmul.f32 -1.442695, %v633_v60  ;;  %v1792_v6 = vmul.f32 -1.442695, %v636_v61 }
 0x356   : > { %1930 = vtanh.f32 %v636_v61 }
 0x357   : > { %1932 = vpow2.f32 %v1791_v0 }
 0x35b   : > { %v1929_v62 = vpop.eup %1928 }
 0x35c   : > { %v1931_v63 = vpop.eup %1930  ;;  %679 = vrot.lane.b32.xlu2 %v1929_v62, %s2274_s28 }
 0x35d   : > { %690 = vrot.lane.b32.xlu0 %v1931_v63, %s2274_s28  ;;  %v1933_v1 = vpop.eup %1932 }
 0x35e   : > { %v640_v2 = vadd.f32 1.0, %v1933_v1 }
 0x360   : > { %1934 = vrcp.f32 %v640_v2  ;;  %v652_v19 = vand.u32 2147483648, %v640_v2  ;;  %vm646_vm12 = vweird.f32 %v640_v2  ;;  %v650_v21 = vand.u32 2147483647, %v640_v2 }
 0x361   : > { %1936 = vpow2.f32 %v1792_v6 }
 0x362   : > { %v653_v25 = vor.u32 1.1754944e-38, %v652_v19  ;;  %vm651_vm14 = vcmp.eq.f32.partialorder %v650_v21, 8.507059e+37 }
 0x366   : > { %v1935_v4 = vpop.eup %1934 }
 0x367   : > { %v642_v7 = vmul.f32 %v1935_v4, %v640_v2  ;;  %v1937_v12 = vpop.eup %1936  ;;  %vm647_vm11 = vweird.f32 %v1935_v4 }
 0x368   : > { %v659_v15 = vadd.f32 1.0, %v1937_v12  ;;  %vm648_vm13 = vmor %vm646_vm12, %vm647_vm11 }
 0x369   : > { %v643_v9 = vsub.f32 1.0, %v642_v7  ;;  %v763_v7 = vrot.slane %v2661_v43, 4 }
 0x36a   : > { %1938 = vrcp.f32 %v659_v15  ;;  %v671_v44 = vand.u32 2147483648, %v659_v15  ;;  %vm665_vm0 = vweird.f32 %v659_v15  ;;  %v669_v46 = vand.u32 2147483647, %v659_v15 }
 0x36b   : > { %v644_v11 = vmul.f32 %v1935_v4, %v643_v9  ;;  %v766_v9 = vrot.slane %v2664_v47, 2 }
 0x36c   : > { %v672_v49 = vor.u32 1.1754944e-38, %v671_v44  ;;  %vm670_vm3 = vcmp.eq.f32.partialorder %v669_v46, 8.507059e+37 }
 0x36d   : > { %v645_v16 = vadd.f32 %v1935_v4, %v644_v11 }
 0x36f   : > { %v649_v23 = vsel %vm648_vm13, %v1935_v4, %v645_v16 }
 0x370   : > { %v654_v29 = vsel %vm651_vm14, %v653_v25, %v649_v23  ;;  %v1939_v32 = vpop.eup %1938 }
 0x371   : > { %v661_v34 = vmul.f32 %v1939_v32, %v659_v15  ;;  %vm666_vm15 = vweird.f32 %v1939_v32  ;;  %v677_v56 = vmul.f32 %v654_v29, %v2671_v38 }
 0x372   : > { %vm667_vm2 = vmor %vm665_vm0, %vm666_vm15 }
 0x373   : > { %v662_v36 = vsub.f32 1.0, %v661_v34 }
 0x375   : > { %v663_v40 = vmul.f32 %v1939_v32, %v662_v36 }
 0x377   : > { %v664_v42 = vadd.f32 %v1939_v32, %v663_v40 }
 0x379   : > { %v668_v48 = vsel %vm667_vm2, %v1939_v32, %v664_v42 }
 0x37a   : > { %v673_v51 = vsel %vm670_vm3, %v672_v49, %v668_v48 }
 0x37b   : > { %v688_v57 = vmul.f32 %v673_v51, %v2674_v45 }
 0x3b6   : > { %v680_v27 = vpop.permute.xlu2 %679 }
 0x3b7   : > { %v682_v31 = vmul.f32 %v680_v27, %v654_v29 }
 0x3b9   : > { %684 = vrot.lane.b32.xlu1 %v682_v31, %s2274_s28 }
 0x3cf   : > { %v691_v50 = vpop.permute.xlu0 %690 }
 0x3d0   : > { %v693_v54 = vmul.f32 %v691_v50, %v673_v51 }
 0x3d2   : > { %695 = vrot.lane.b32.xlu2 %v693_v54, %s2274_s28 }
 0x42b   : > { %v685_v58 = vpop.permute.xlu1 %684 }
 0x42c   : > { %v696_v59 = vpop.permute.xlu2 %695  ;;  %v2716_v60 = vadd.f32 %v685_v58, %v677_v56 }
 0x42d   : > { %v2718_v61 = vadd.f32 %v696_v59, %v688_v57 }
 0x42e   : > { %1940 = vtanh.f32 %v2716_v60 }
 0x42f   : > { %1942 = vtanh.f32 %v2718_v61 }
 0x434   : > { %v1941_v62 = vpop.eup %1940 }
 0x435   : > { %v1943_v63 = vpop.eup %1942  ;;  %701 = vrot.lane.b32.xlu0 %v1941_v62, %s2274_s28 }
 0x436   : > { %707 = vrot.lane.b32.xlu1 %v1943_v63, %s2274_s28 }
 0x4a7   : > { %v702_v0 = vpop.permute.xlu0 %701 }
 0x4a8   : > { %v708_v38 = vpop.permute.xlu1 %707  ;;  %v704_v1 = vmul.f32 %v702_v0, %v654_v29 }
 0x4a9   : > { %v710_v45 = vmul.f32 %v708_v38, %v673_v51 }
 0x4aa   : > { %712 = vrot.lane.b32.xlu2 %v704_v1, %s2275_s29 }
 0x4ab   : > { %716 = vrot.lane.b32.xlu0 %v710_v45, %s2276_s0 }
 0x504   : > { %v2726_v2 = vpop.permute.xlu2 %712 }
 0x51d   : > { %v2728_v4 = vpop.permute.xlu0 %716 }
 0x51e   : > { %v719_v6 = vsel %vm585_vm10, %v2726_v2, %v2728_v4 }
 0x51f   : > { %1793 = vmatmul.msk.f32.vlgmr.msrb.gmra.mxu2 %vm386_vm1, %v719_v6  ;;  %1794 = vmatmul.msk.f32.vlgmr.msrb.gmra.mxu3 %vm386_vm1, %v719_v6 }
 0x520   : > { %1257 = vmatpush.msrb.mxu2 %v2506_v3  ;;  %1277 = vmatpush.msrb.mxu3 %v2521_v10 }
 0x522   : > { %1258 = vmatpush.msrb.mxu2 %v2511_v5  ;;  %1278 = vmatpush.msrb.mxu3 %v2530_v14 }
 0x524   : > { %1259 = vmatpush.msrb.mxu2 %v2516_v8  ;;  %1279 = vmatpush.msrb.mxu3 %v2540_v18 }
 0x526   : > { %1260 = vmatpush.msrb.mxu2 %v2526_v13  ;;  %1280 = vmatpush.msrb.mxu3 %v2545_v20 }
 0x528   : > { %1261 = vmatpush.msrb.mxu2 %v2536_v17  ;;  %1281 = vmatpush.msrb.mxu3 %v2555_v24 }
 0x52a   : > { %1262 = vmatpush.msrb.mxu2 %v2549_v22  ;;  %1282 = vmatpush.msrb.mxu3 %v2565_v28 }
 0x52c   : > { %1263 = vmatpush.msrb.mxu2 %v2559_v26  ;;  %1283 = vmatpush.msrb.mxu3 %v2576_v33 }
 0x52e   : > { %1264 = vmatpush.msrb.mxu2 %v2569_v30  ;;  %1284 = vmatpush.msrb.mxu3 %v2581_v35 }
 0x5a2   : > { %v740_v11 = vpop.f32.mrf.mxu2  ;;  %v760_v12 = vpop.f32.mrf.mxu3 }
 0x5a3   : > { %v765_v15 = vadd.f32 %v763_v7, %v740_v11  ;;  %v768_v16 = vadd.f32 %v766_v9, %v760_v12 }
 0x5a5   : > { %1944 = vtanh.f32 %v765_v15  ;;  %v1796_v23 = vmul.f32 -1.442695, %v768_v16  ;;  %v1795_v31 = vmul.f32 -1.442695, %v765_v15 }
 0x5a6   : > { %1946 = vtanh.f32 %v768_v16 }
 0x5a7   : > { %1948 = vpow2.f32 %v1796_v23 }
 0x5ab   : > { %v1945_v19 = vpop.eup %1944 }
 0x5ac   : > { %v1947_v21 = vpop.eup %1946  ;;  %811 = vrot.lane.b32.xlu1 %v1945_v19, %s2274_s28 }
 0x5ad   : > { %822 = vrot.lane.b32.xlu2 %v1947_v21, %s2274_s28  ;;  %v1949_v25 = vpop.eup %1948 }
 0x5ae   : > { %v791_v27 = vadd.f32 1.0, %v1949_v25 }
 0x5b0   : > { %1950 = vrcp.f32 %v791_v27  ;;  %v803_v46 = vand.u32 2147483648, %v791_v27  ;;  %vm797_vm5 = vweird.f32 %v791_v27  ;;  %v801_v48 = vand.u32 2147483647, %v791_v27 }
 0x5b1   : > { %1952 = vpow2.f32 %v1795_v31 }
 0x5b2   : > { %v804_v50 = vor.u32 1.1754944e-38, %v803_v46  ;;  %vm802_vm7 = vcmp.eq.f32.partialorder %v801_v48, 8.507059e+37 }
 0x5b6   : > { %v1951_v29 = vpop.eup %1950 }
 0x5b7   : > { %v793_v32 = vmul.f32 %v1951_v29, %v791_v27  ;;  %v1953_v36 = vpop.eup %1952  ;;  %vm798_vm4 = vweird.f32 %v1951_v29 }
 0x5b8   : > { %v772_v42 = vadd.f32 1.0, %v1953_v36  ;;  %vm799_vm6 = vmor %vm797_vm5, %vm798_vm4 }
 0x5b9   : > { %v794_v34 = vsub.f32 1.0, %v793_v32 }
 0x5ba   : > { %1954 = vrcp.f32 %v772_v42  ;;  %v784_v0 = vand.u32 2147483648, %v772_v42  ;;  %vm778_vm9 = vweird.f32 %v772_v42  ;;  %v782_v38 = vand.u32 2147483647, %v772_v42 }
 0x5bb   : > { %v795_v40 = vmul.f32 %v1951_v29, %v794_v34 }
 0x5bc   : > { %v785_v45 = vor.u32 1.1754944e-38, %v784_v0  ;;  %vm783_vm12 = vcmp.eq.f32.partialorder %v782_v38, 8.507059e+37 }
 0x5bd   : > { %v796_v44 = vadd.f32 %v1951_v29, %v795_v40 }
 0x5bf   : > { %v800_v49 = vsel %vm799_vm6, %v1951_v29, %v796_v44 }
 0x5c0   : > { %v805_v54 = vsel %vm802_vm7, %v804_v50, %v800_v49  ;;  %v1955_v56 = vpop.eup %1954 }
 0x5c1   : > { %v774_v58 = vmul.f32 %v1955_v56, %v772_v42  ;;  %vm779_vm8 = vweird.f32 %v1955_v56  ;;  %v820_v11 = vmul.f32 %v805_v54, %v2718_v61 }
 0x5c2   : > { %vm780_vm11 = vmor %vm778_vm9, %vm779_vm8 }
 0x5c3   : > { %v775_v59 = vsub.f32 1.0, %v774_v58 }
 0x5c5   : > { %v776_v62 = vmul.f32 %v1955_v56, %v775_v59 }
 0x5c7   : > { %v777_v63 = vadd.f32 %v1955_v56, %v776_v62 }
 0x5c9   : > { %v781_v1 = vsel %vm780_vm11, %v1955_v56, %v777_v63 }
 0x5ca   : > { %v786_v7 = vsel %vm783_vm12, %v785_v45, %v781_v1 }
 0x5cb   : > { %v809_v19 = vmul.f32 %v786_v7, %v2716_v60 }
 0x607   : > { %v823_v51 = vpop.permute.xlu2 %822 }
 0x608   : > { %v825_v57 = vmul.f32 %v823_v51, %v805_v54 }
 0x60a   : > { %827 = vrot.lane.b32.xlu1 %v825_v57, %s2274_s28 }
 0x61e   : > { %v812_v6 = vpop.permute.xlu1 %811 }
 0x61f   : > { %v814_v9 = vmul.f32 %v812_v6, %v786_v7 }
 0x621   : > { %816 = vrot.lane.b32.xlu0 %v814_v9, %s2274_s28 }
 0x67c   : > { %v828_v12 = vpop.permute.xlu1 %827 }
 0x67d   : > { %v2758_v15 = vadd.f32 %v828_v12, %v820_v11 }
 0x67f   : > { %1956 = vtanh.f32 %v2758_v15 }
 0x685   : > { %v1957_v16 = vpop.eup %1956 }
 0x686   : > { %839 = vrot.lane.b32.xlu0 %v1957_v16, %s2274_s28 }
 0x693   : > { %v817_v21 = vpop.permute.xlu0 %816 }
 0x694   : > { %v2763_v23 = vadd.f32 %v817_v21, %v809_v19 }
 0x696   : > { %1958 = vtanh.f32 %v2763_v23 }
 0x69c   : > { %v1959_v25 = vpop.eup %1958 }
 0x69d   : > { %833 = vrot.lane.b32.xlu2 %v1959_v25, %s2274_s28 }
 0x6f7   : > { %v834_v27 = vpop.permute.xlu2 %833 }
 0x6f8   : > { %v840_v61 = vpop.permute.xlu0 %839  ;;  %v836_v29 = vmul.f32 %v834_v27, %v786_v7 }
 0x6f9   : > { %v842_v31 = vmul.f32 %v840_v61, %v805_v54 }
 0x6fa   : > { %844 = vrot.lane.b32.xlu1 %v836_v29, %s2275_s29 }
 0x6fb   : > { %848 = vrot.lane.b32.xlu2 %v842_v31, %s2276_s0  ;;  %v2824_v31 = vadd.f32 %v2706_v55, %v382_v39 }
 0x755   : > { %v2769_v32 = vpop.permute.xlu2 %848 }
 0x76c   : > { %v2771_v34 = vpop.permute.xlu1 %844 }
 0x76d   : > { %v851_v60 = vsel %vm585_vm10, %v2771_v34, %v2769_v32 }
 0x76e   : > { %1797 = vmatmul.msk.f32.vlgmr.msra.gmra.mxu0 %vm386_vm1, %v851_v60  ;;  %1798 = vmatmul.msk.f32.vlgmr.msra.gmra.mxu1 %vm386_vm1, %v851_v60  ;;  %v1027_v60 = vrot.slane %v2657_v41, 6 }
 0x76f   : > { %1389 = vmatpush.msra.mxu0 %v2506_v3  ;;  %1409 = vmatpush.msra.mxu1 %v2521_v10  ;;  %v895_v3 = vrot.slane %v2661_v43, 6 }
 0x771   : > { %1390 = vmatpush.msra.mxu0 %v2511_v5  ;;  %1410 = vmatpush.msra.mxu1 %v2530_v14 }
 0x773   : > { %1391 = vmatpush.msra.mxu0 %v2516_v8  ;;  %1411 = vmatpush.msra.mxu1 %v2540_v18 }
 0x775   : > { %1392 = vmatpush.msra.mxu0 %v2526_v13  ;;  %1412 = vmatpush.msra.mxu1 %v2545_v20 }
 0x777   : > { %1393 = vmatpush.msra.mxu0 %v2536_v17  ;;  %1413 = vmatpush.msra.mxu1 %v2555_v24 }
 0x779   : > { %1394 = vmatpush.msra.mxu0 %v2549_v22  ;;  %1414 = vmatpush.msra.mxu1 %v2565_v28 }
 0x77b   : > { %1395 = vmatpush.msra.mxu0 %v2559_v26  ;;  %1415 = vmatpush.msra.mxu1 %v2576_v33 }
 0x77d   : > { %1396 = vmatpush.msra.mxu0 %v2569_v30  ;;  %1416 = vmatpush.msra.mxu1 %v2581_v35 }
 0x7eb   : > { %v872_v5 = vpop.f32.mrf.mxu0  ;;  %v892_v8 = vpop.f32.mrf.mxu1 }
 0x7ec   : > { %v897_v10 = vadd.f32 %v895_v3, %v872_v5  ;;  %v898_v13 = vadd.f32 %v892_v8, %v2664_v47 }
 0x7ee   : > { %1960 = vtanh.f32 %v897_v10  ;;  %v1799_v18 = vmul.f32 -1.442695, %v897_v10  ;;  %v1800_v20 = vmul.f32 -1.442695, %v898_v13 }
 0x7ef   : > { %1962 = vtanh.f32 %v898_v13 }
 0x7f0   : > { %1964 = vpow2.f32 %v1799_v18 }
 0x7f1   : > { %1966 = vpow2.f32 %v1800_v20 }
 0x7f4   : > { %v1961_v14 = vpop.eup %1960 }
 0x7f5   : > { %v1963_v17 = vpop.eup %1962  ;;  %941 = vrot.lane.b32.xlu0 %v1961_v14, %s2274_s28 }
 0x7f6   : > { %952 = vrot.lane.b32.xlu1 %v1963_v17, %s2274_s28  ;;  %v1965_v22 = vpop.eup %1964 }
 0x7f7   : > { %v1967_v24 = vpop.eup %1966  ;;  %v902_v26 = vadd.f32 1.0, %v1965_v22 }
 0x7f8   : > { %v921_v28 = vadd.f32 1.0, %v1967_v24 }
 0x7f9   : > { %1968 = vrcp.f32 %v902_v26  ;;  %v914_v48 = vand.u32 2147483648, %v902_v26  ;;  %vm908_vm15 = vweird.f32 %v902_v26  ;;  %v912_v50 = vand.u32 2147483647, %v902_v26 }
 0x7fa   : > { %1970 = vrcp.f32 %v921_v28  ;;  %v933_v49 = vand.u32 2147483648, %v921_v28  ;;  %vm927_vm0 = vweird.f32 %v921_v28  ;;  %v931_v51 = vand.u32 2147483647, %v921_v28 }
 0x7fb   : > { %v915_v57 = vor.u32 1.1754944e-38, %v914_v48  ;;  %vm913_vm4 = vcmp.eq.f32.partialorder %v912_v50, 8.507059e+37 }
 0x7fc   : > { %v934_v58 = vor.u32 1.1754944e-38, %v933_v49  ;;  %vm932_vm5 = vcmp.eq.f32.partialorder %v931_v51, 8.507059e+37 }
 0x7ff   : > { %v1969_v30 = vpop.eup %1968 }
 0x800   : > { %v1971_v33 = vpop.eup %1970  ;;  %v904_v35 = vmul.f32 %v1969_v30, %v902_v26  ;;  %vm909_vm13 = vweird.f32 %v1969_v30 }
 0x801   : > { %v923_v43 = vmul.f32 %v1971_v33, %v921_v28  ;;  %vm928_vm14 = vweird.f32 %v1971_v33  ;;  %vm910_vm2 = vmor %vm908_vm15, %vm909_vm13 }
 0x802   : > { %v905_v47 = vsub.f32 1.0, %v904_v35  ;;  %vm929_vm3 = vmor %vm927_vm0, %vm928_vm14 }
 0x803   : > { %v924_v36 = vsub.f32 1.0, %v923_v43 }
 0x804   : > { %v906_v40 = vmul.f32 %v1969_v30, %v905_v47 }
 0x805   : > { %v925_v42 = vmul.f32 %v1971_v33, %v924_v36 }
 0x806   : > { %v907_v44 = vadd.f32 %v1969_v30, %v906_v40 }
 0x807   : > { %v926_v46 = vadd.f32 %v1971_v33, %v925_v42 }
 0x808   : > { %v911_v54 = vsel %vm910_vm2, %v1969_v30, %v907_v44 }
 0x809   : > { %v930_v56 = vsel %vm929_vm3, %v1971_v33, %v926_v46  ;;  %v916_v62 = vsel %vm913_vm4, %v915_v57, %v911_v54 }
 0x80a   : > { %v935_v0 = vsel %vm932_vm5, %v934_v58, %v930_v56  ;;  %v939_v45 = vmul.f32 %v916_v62, %v2763_v23 }
 0x80b   : > { %v950_v11 = vmul.f32 %v935_v0, %v2758_v15 }
 0x867   : > { %v942_v59 = vpop.permute.xlu0 %941 }
 0x868   : > { %v953_v63 = vpop.permute.xlu1 %952  ;;  %v944_v38 = vmul.f32 %v942_v59, %v916_v62 }
 0x869   : > { %v955_v1 = vmul.f32 %v953_v63, %v935_v0 }
 0x86a   : > { %946 = vrot.lane.b32.xlu2 %v944_v38, %s2274_s28 }
 0x86b   : > { %957 = vrot.lane.b32.xlu0 %v955_v1, %s2274_s28 }
 0x8c4   : > { %v947_v6 = vpop.permute.xlu2 %946 }
 0x8c5   : > { %v2801_v7 = vadd.f32 %v947_v6, %v939_v45 }
 0x8c7   : > { %1972 = vtanh.f32 %v2801_v7 }
 0x8cd   : > { %v1973_v9 = vpop.eup %1972 }
 0x8ce   : > { %963 = vrot.lane.b32.xlu1 %v1973_v9, %s2274_s28 }
 0x8dd   : > { %v958_v12 = vpop.permute.xlu0 %957 }
 0x8de   : > { %v2806_v16 = vadd.f32 %v958_v12, %v950_v11 }
 0x8e0   : > { %1974 = vtanh.f32 %v2806_v16 }
 0x8e6   : > { %v1975_v19 = vpop.eup %1974 }
 0x8e7   : > { %969 = vrot.lane.b32.xlu2 %v1975_v19, %s2274_s28 }
 0x940   : > { %v964_v21 = vpop.permute.xlu1 %963 }
 0x941   : > { %v970_v23 = vpop.permute.xlu2 %969  ;;  %v966_v25 = vmul.f32 %v964_v21, %v916_v62 }
 0x942   : > { %v972_v27 = vmul.f32 %v970_v23, %v935_v0 }
 0x943   : > { %974 = vrot.lane.b32.xlu0 %v966_v25, %s2275_s29 }
 0x944   : > { %978 = vrot.lane.b32.xlu1 %v972_v27, %s2276_s0  ;;  %v1157_v27 = vrot.slane %v2824_v31, 2 }
 0x9b5   : > { %v2812_v61 = vpop.permute.xlu0 %974 }
 0x9b6   : > { %v2814_v29 = vpop.permute.xlu1 %978 }
 0x9b7   : > { %v981_v15 = vsel %vm585_vm10, %v2812_v61, %v2814_v29 }
 0x9b8   : > { %1801 = vmatmul.msk.f32.vlgmr.msra.gmra.mxu2 %vm386_vm1, %v981_v15  ;;  %1802 = vmatmul.msk.f32.vlgmr.msra.gmra.mxu3 %vm386_vm1, %v981_v15  ;;  %v1160_v15 = vrot.slane %v2657_v41, 4 }
 0xa3b   : > { %v1002_v3 = vpop.f32.mrf.mxu2  ;;  %v1022_v5 = vpop.f32.mrf.mxu3 }
 0xa3c   : > { %v1025_v8 = vadd.f32 %v1002_v3, %v2824_v31  ;;  %v1029_v10 = vadd.f32 %v1027_v60, %v1022_v5 }
 0xa3e   : > { %1976 = vtanh.f32 %v1025_v8  ;;  %v1803_v17 = vmul.f32 -1.442695, %v1025_v8  ;;  %v1804_v18 = vmul.f32 -1.442695, %v1029_v10 }
 0xa3f   : > { %1978 = vtanh.f32 %v1029_v10 }
 0xa40   : > { %1980 = vpow2.f32 %v1803_v17 }
 0xa44   : > { %v1977_v13 = vpop.eup %1976 }
 0xa45   : > { %v1979_v14 = vpop.eup %1978  ;;  %1072 = vrot.lane.b32.xlu2 %v1977_v13, %s2274_s28 }
 0xa46   : > { %1083 = vrot.lane.b32.xlu0 %v1979_v14, %s2274_s28  ;;  %v1981_v37 = vpop.eup %1980 }
 0xa47   : > { %v1033_v39 = vadd.f32 1.0, %v1981_v37 }
 0xa49   : > { %1982 = vrcp.f32 %v1033_v39  ;;  %v1045_v33 = vand.u32 2147483648, %v1033_v39  ;;  %vm1039_vm7 = vweird.f32 %v1033_v39  ;;  %v1043_v35 = vand.u32 2147483647, %v1033_v39 }
 0xa4a   : > { %1984 = vpow2.f32 %v1804_v18 }
 0xa4b   : > { %v1046_v47 = vor.u32 1.1754944e-38, %v1045_v33  ;;  %vm1044_vm9 = vcmp.eq.f32.partialorder %v1043_v35, 8.507059e+37 }
 0xa4f   : > { %v1983_v55 = vpop.eup %1982 }
 0xa50   : > { %v1035_v20 = vmul.f32 %v1983_v55, %v1033_v39  ;;  %v1985_v26 = vpop.eup %1984  ;;  %vm1040_vm6 = vweird.f32 %v1983_v55 }
 0xa51   : > { %v1052_v28 = vadd.f32 1.0, %v1985_v26  ;;  %vm1041_vm8 = vmor %vm1039_vm7, %vm1040_vm6 }
 0xa52   : > { %v1036_v22 = vsub.f32 1.0, %v1035_v20 }
 0xa53   : > { %1986 = vrcp.f32 %v1052_v28  ;;  %v1064_v51 = vand.u32 2147483648, %v1052_v28  ;;  %vm1058_vm12 = vweird.f32 %v1052_v28  ;;  %v1062_v54 = vand.u32 2147483647, %v1052_v28 }
 0xa54   : > { %v1037_v24 = vmul.f32 %v1983_v55, %v1036_v22 }
 0xa55   : > { %v1065_v57 = vor.u32 1.1754944e-38, %v1064_v51  ;;  %vm1063_vm14 = vcmp.eq.f32.partialorder %v1062_v54, 8.507059e+37 }
 0xa56   : > { %v1038_v30 = vadd.f32 %v1983_v55, %v1037_v24 }
 0xa58   : > { %v1042_v43 = vsel %vm1041_vm8, %v1983_v55, %v1038_v30 }
 0xa59   : > { %v1047_v40 = vsel %vm1044_vm9, %v1046_v47, %v1042_v43  ;;  %v1987_v44 = vpop.eup %1986 }
 0xa5a   : > { %v1054_v46 = vmul.f32 %v1987_v44, %v1052_v28  ;;  %vm1059_vm11 = vweird.f32 %v1987_v44  ;;  %v1070_v63 = vmul.f32 %v1047_v40, %v2801_v7 }
 0xa5b   : > { %vm1060_vm13 = vmor %vm1058_vm12, %vm1059_vm11 }
 0xa5c   : > { %v1055_v48 = vsub.f32 1.0, %v1054_v46 }
 0xa5e   : > { %v1056_v49 = vmul.f32 %v1987_v44, %v1055_v48 }
 0xa60   : > { %v1057_v50 = vadd.f32 %v1987_v44, %v1056_v49 }
 0xa62   : > { %v1061_v56 = vsel %vm1060_vm13, %v1987_v44, %v1057_v50 }
 0xa63   : > { %v1066_v59 = vsel %vm1063_vm14, %v1065_v57, %v1061_v56 }
 0xa64   : > { %v1081_v0 = vmul.f32 %v1066_v59, %v2806_v16 }
 0xa9f   : > { %v1073_v36 = vpop.permute.xlu2 %1072 }
 0xaa0   : > { %v1075_v42 = vmul.f32 %v1073_v36, %v1047_v40 }
 0xaa2   : > { %1077 = vrot.lane.b32.xlu1 %v1075_v42, %s2274_s28 }
 0xab8   : > { %v1084_v58 = vpop.permute.xlu0 %1083 }
 0xab9   : > { %v1086_v62 = vmul.f32 %v1084_v58, %v1066_v59 }
 0xabb   : > { %1088 = vrot.lane.b32.xlu2 %v1086_v62, %s2274_s28 }
 0xb14   : > { %v1078_v38 = vpop.permute.xlu1 %1077 }
 0xb15   : > { %v1089_v1 = vpop.permute.xlu2 %1088  ;;  %v2834_v45 = vadd.f32 %v1078_v38, %v1070_v63 }
 0xb16   : > { %v2836_v6 = vadd.f32 %v1089_v1, %v1081_v0 }
 0xb17   : > { %1988 = vtanh.f32 %v2834_v45 }
 0xb18   : > { %1990 = vtanh.f32 %v2836_v6 }
 0xb1d   : > { %v1989_v9 = vpop.eup %1988 }
 0xb1e   : > { %v1991_v11 = vpop.eup %1990  ;;  %1094 = vrot.lane.b32.xlu0 %v1989_v9, %s2274_s28 }
 0xb1f   : > { %1100 = vrot.lane.b32.xlu1 %v1991_v11, %s2274_s28 }
 0xb90   : > { %v1095_v12 = vpop.permute.xlu0 %1094 }
 0xb91   : > { %v1101_v7 = vpop.permute.xlu1 %1100  ;;  %v1097_v19 = vmul.f32 %v1095_v12, %v1047_v40 }
 0xb92   : > { %v1103_v16 = vmul.f32 %v1101_v7, %v1066_v59 }
 0xb93   : > { %1105 = vrot.lane.b32.xlu2 %v1097_v19, %s2275_s29 }
 0xb94   : > { %1109 = vrot.lane.b32.xlu0 %v1103_v16, %s2276_s0 }
 0xbed   : > { %v2844_v21 = vpop.permute.xlu2 %1105 }
 0xc06   : > { %v2846_v23 = vpop.permute.xlu0 %1109 }
 0xc07   : > { %v1112_v25 = vsel %vm585_vm10, %v2844_v21, %v2846_v23 }
 0xc08   : > { %1805 = vmatmul.msk.f32.vlgmr.msrb.gmra.mxu0 %vm386_vm1, %v1112_v25  ;;  %1806 = vmatmul.msk.f32.vlgmr.msrb.gmra.mxu1 %vm386_vm1, %v1112_v25 }
 0xc85   : > { %v1133_v60 = vpop.f32.mrf.mxu0  ;;  %v1153_v3 = vpop.f32.mrf.mxu1 }
 0xc86   : > { %v1159_v5 = vadd.f32 %v1157_v27, %v1133_v60  ;;  %v1162_v8 = vadd.f32 %v1160_v15, %v1153_v3  ;;  %v1289_v15 = vrot.slane %v2824_v31, 4  ;;  %v1292_v60 = vrot.slane %v2657_v41, 2 }
 0xc88   : > { %1992 = vtanh.f32 %v1159_v5  ;;  %v1808_v14 = vmul.f32 -1.442695, %v1162_v8  ;;  %v1807_v55 = vmul.f32 -1.442695, %v1159_v5 }
 0xc89   : > { %1994 = vtanh.f32 %v1162_v8 }
 0xc8a   : > { %1996 = vpow2.f32 %v1808_v14 }
 0xc8e   : > { %v1993_v10 = vpop.eup %1992 }
 0xc8f   : > { %v1995_v13 = vpop.eup %1994  ;;  %1205 = vrot.lane.b32.xlu1 %v1993_v10, %s2274_s28 }
 0xc90   : > { %1216 = vrot.lane.b32.xlu2 %v1995_v13, %s2274_s28  ;;  %v1997_v17 = vpop.eup %1996 }
 0xc91   : > { %v1185_v37 = vadd.f32 1.0, %v1997_v17 }
 0xc93   : > { %1998 = vrcp.f32 %v1185_v37  ;;  %v1197_v30 = vand.u32 2147483648, %v1185_v37  ;;  %vm1191_vm0 = vweird.f32 %v1185_v37  ;;  %v1195_v33 = vand.u32 2147483647, %v1185_v37 }
 0xc94   : > { %2000 = vpow2.f32 %v1807_v55 }
 0xc95   : > { %v1198_v43 = vor.u32 1.1754944e-38, %v1197_v30  ;;  %vm1196_vm3 = vcmp.eq.f32.partialorder %v1195_v33, 8.507059e+37 }
 0xc99   : > { %v1999_v39 = vpop.eup %1998 }
 0xc9a   : > { %v1187_v18 = vmul.f32 %v1999_v39, %v1185_v37  ;;  %v2001_v22 = vpop.eup %2000  ;;  %vm1192_vm15 = vweird.f32 %v1999_v39 }
 0xc9b   : > { %v1166_v26 = vadd.f32 1.0, %v2001_v22  ;;  %vm1193_vm2 = vmor %vm1191_vm0, %vm1192_vm15 }
 0xc9c   : > { %v1188_v20 = vsub.f32 1.0, %v1187_v18 }
 0xc9d   : > { %2002 = vrcp.f32 %v1166_v26  ;;  %v1178_v50 = vand.u32 2147483648, %v1166_v26  ;;  %vm1172_vm5 = vweird.f32 %v1166_v26  ;;  %v1176_v51 = vand.u32 2147483647, %v1166_v26 }
 0xc9e   : > { %v1189_v24 = vmul.f32 %v1999_v39, %v1188_v20 }
 0xc9f   : > { %v1179_v56 = vor.u32 1.1754944e-38, %v1178_v50  ;;  %vm1177_vm7 = vcmp.eq.f32.partialorder %v1176_v51, 8.507059e+37 }
 0xca0   : > { %v1190_v28 = vadd.f32 %v1999_v39, %v1189_v24 }
 0xca2   : > { %v1194_v35 = vsel %vm1193_vm2, %v1999_v39, %v1190_v28 }
 0xca3   : > { %v1199_v36 = vsel %vm1196_vm3, %v1198_v43, %v1194_v35  ;;  %v2003_v40 = vpop.eup %2002 }
 0xca4   : > { %v1168_v44 = vmul.f32 %v2003_v40, %v1166_v26  ;;  %vm1173_vm4 = vweird.f32 %v2003_v40  ;;  %v1214_v62 = vmul.f32 %v1199_v36, %v2836_v6 }
 0xca5   : > { %vm1174_vm6 = vmor %vm1172_vm5, %vm1173_vm4 }
 0xca6   : > { %v1169_v46 = vsub.f32 1.0, %v1168_v44 }
 0xca8   : > { %v1170_v48 = vmul.f32 %v2003_v40, %v1169_v46 }
 0xcaa   : > { %v1171_v49 = vadd.f32 %v2003_v40, %v1170_v48 }
 0xcac   : > { %v1175_v54 = vsel %vm1174_vm6, %v2003_v40, %v1171_v49 }
 0xcad   : > { %v1180_v58 = vsel %vm1177_vm7, %v1179_v56, %v1175_v54 }
 0xcae   : > { %v1203_v1 = vmul.f32 %v1180_v58, %v2834_v45 }
 0xcea   : > { %v1217_v47 = vpop.permute.xlu2 %1216 }
 0xceb   : > { %v1219_v42 = vmul.f32 %v1217_v47, %v1199_v36 }
 0xced   : > { %1221 = vrot.lane.b32.xlu1 %v1219_v42, %s2274_s28 }
 0xd01   : > { %v1206_v57 = vpop.permute.xlu1 %1205 }
 0xd02   : > { %v1208_v59 = vmul.f32 %v1206_v57, %v1180_v58 }
 0xd04   : > { %1210 = vrot.lane.b32.xlu0 %v1208_v59, %s2274_s28 }
 0xd5f   : > { %v1222_v63 = vpop.permute.xlu1 %1221 }
 0xd60   : > { %v2860_v0 = vadd.f32 %v1222_v63, %v1214_v62 }
 0xd62   : > { %2004 = vtanh.f32 %v2860_v0 }
 0xd68   : > { %v2005_v38 = vpop.eup %2004 }
 0xd69   : > { %1233 = vrot.lane.b32.xlu0 %v2005_v38, %s2274_s28 }
 0xd76   : > { %v1211_v9 = vpop.permute.xlu0 %1210 }
 0xd77   : > { %v2865_v11 = vadd.f32 %v1211_v9, %v1203_v1 }
 0xd79   : > { %2006 = vtanh.f32 %v2865_v11 }
 0xd7f   : > { %v2007_v12 = vpop.eup %2006 }
 0xd80   : > { %1227 = vrot.lane.b32.xlu2 %v2007_v12, %s2274_s28 }
 0xdda   : > { %v1228_v7 = vpop.permute.xlu2 %1227 }
 0xddb   : > { %v1234_v6 = vpop.permute.xlu0 %1233  ;;  %v1230_v19 = vmul.f32 %v1228_v7, %v1180_v58 }
 0xddc   : > { %v1236_v16 = vmul.f32 %v1234_v6, %v1199_v36 }
 0xddd   : > { %1238 = vrot.lane.b32.xlu1 %v1230_v19, %s2275_s29 }
 0xdde   : > { %1242 = vrot.lane.b32.xlu2 %v1236_v16, %s2276_s0 }
 0xe38   : > { %v2871_v25 = vpop.permute.xlu2 %1242 }
 0xe4f   : > { %v2873_v27 = vpop.permute.xlu1 %1238 }
 0xe50   : > { %v1245_v45 = vsel %vm585_vm10, %v2873_v27, %v2871_v25 }
 0xe51   : > { %1809 = vmatmul.msk.f32.vlgmr.msrb.gmra.mxu2 %vm386_vm1, %v1245_v45  ;;  %1810 = vmatmul.msk.f32.vlgmr.msrb.gmra.mxu3 %vm386_vm1, %v1245_v45 }
 0xed4   : > { %v1266_v3 = vpop.f32.mrf.mxu2  ;;  %v1286_v5 = vpop.f32.mrf.mxu3 }
 0xed5   : > { %v1291_v8 = vadd.f32 %v1289_v15, %v1266_v3  ;;  %v1294_v10 = vadd.f32 %v1292_v60, %v1286_v5  ;;  %v1421_v5 = vrot.slane %v2824_v31, 6 }
 0xed7   : > { %2008 = vtanh.f32 %v1291_v8  ;;  %v1811_v17 = vmul.f32 -1.442695, %v1291_v8  ;;  %v1812_v37 = vmul.f32 -1.442695, %v1294_v10 }
 0xed8   : > { %2010 = vtanh.f32 %v1294_v10 }
 0xed9   : > { %2012 = vpow2.f32 %v1811_v17 }
 0xeda   : > { %2014 = vpow2.f32 %v1812_v37 }
 0xedd   : > { %v2009_v13 = vpop.eup %2008 }
 0xede   : > { %v2011_v14 = vpop.eup %2010  ;;  %1337 = vrot.lane.b32.xlu0 %v2009_v13, %s2274_s28 }
 0xedf   : > { %1348 = vrot.lane.b32.xlu1 %v2011_v14, %s2274_s28  ;;  %v2013_v39 = vpop.eup %2012 }
 0xee0   : > { %v2015_v55 = vpop.eup %2014  ;;  %v1298_v18 = vadd.f32 1.0, %v2013_v39 }
 0xee1   : > { %v1317_v20 = vadd.f32 1.0, %v2015_v55 }
 0xee2   : > { %2016 = vrcp.f32 %v1298_v18  ;;  %v1310_v40 = vand.u32 2147483648, %v1298_v18  ;;  %vm1304_vm11 = vweird.f32 %v1298_v18  ;;  %v1308_v44 = vand.u32 2147483647, %v1298_v18 }
 0xee3   : > { %2018 = vrcp.f32 %v1317_v20  ;;  %v1329_v42 = vand.u32 2147483648, %v1317_v20  ;;  %vm1323_vm12 = vweird.f32 %v1317_v20  ;;  %v1327_v46 = vand.u32 2147483647, %v1317_v20 }
 0xee4   : > { %v1311_v50 = vor.u32 1.1754944e-38, %v1310_v40  ;;  %vm1309_vm15 = vcmp.eq.f32.partialorder %v1308_v44, 8.507059e+37 }
 0xee5   : > { %v1330_v51 = vor.u32 1.1754944e-38, %v1329_v42  ;;  %vm1328_vm0 = vcmp.eq.f32.partialorder %v1327_v46, 8.507059e+37 }
 0xee8   : > { %v2017_v22 = vpop.eup %2016 }
 0xee9   : > { %v2019_v24 = vpop.eup %2018  ;;  %v1300_v26 = vmul.f32 %v2017_v22, %v1298_v18  ;;  %vm1305_vm8 = vweird.f32 %v2017_v22 }
 0xeea   : > { %v1319_v28 = vmul.f32 %v2019_v24, %v1317_v20  ;;  %vm1324_vm9 = vweird.f32 %v2019_v24  ;;  %vm1306_vm13 = vmor %vm1304_vm11, %vm1305_vm8  ;;  %vm1553_vm11 = vcmask 1041408  }
 0xeeb   : > { %v1301_v30 = vsub.f32 1.0, %v1300_v26  ;;  %vm1325_vm14 = vmor %vm1323_vm12, %vm1324_vm9  ;;  %vm1555_vm12 = vcmask 1043456  }
 0xeec   : > { %v1320_v33 = vsub.f32 1.0, %v1319_v28 }
 0xeed   : > { %v1302_v35 = vmul.f32 %v2017_v22, %v1301_v30 }
 0xeee   : > { %v1321_v43 = vmul.f32 %v2019_v24, %v1320_v33 }
 0xeef   : > { %v1303_v47 = vadd.f32 %v2017_v22, %v1302_v35 }
 0xef0   : > { %v1322_v36 = vadd.f32 %v2019_v24, %v1321_v43 }
 0xef1   : > { %v1307_v48 = vsel %vm1306_vm13, %v2017_v22, %v1303_v47  ;;  %vm1557_vm13 = vcmask 1045504  }
 0xef2   : > { %v1326_v49 = vsel %vm1325_vm14, %v2019_v24, %v1322_v36  ;;  %v1312_v56 = vsel %vm1309_vm15, %v1311_v50, %v1307_v48  ;;  %vm1508_vm14 = vcmask 254976  }
 0xef3   : > { %v1331_v58 = vsel %vm1328_vm0, %v1330_v51, %v1326_v49  ;;  %v1335_v63 = vmul.f32 %v1312_v56, %v2865_v11 }
 0xef4   : > { %v1346_v12 = vmul.f32 %v1331_v58, %v2860_v0 }
 0xf50   : > { %v1338_v54 = vpop.permute.xlu0 %1337 }
 0xf51   : > { %v1349_v57 = vpop.permute.xlu1 %1348  ;;  %v1340_v59 = vmul.f32 %v1338_v54, %v1312_v56 }
 0xf52   : > { %v1351_v62 = vmul.f32 %v1349_v57, %v1331_v58 }
 0xf53   : > { %1342 = vrot.lane.b32.xlu2 %v1340_v59, %s2274_s28 }
 0xf54   : > { %1353 = vrot.lane.b32.xlu0 %v1351_v62, %s2274_s28 }
 0xfad   : > { %v1343_v38 = vpop.permute.xlu2 %1342 }
 0xfae   : > { %v2887_v1 = vadd.f32 %v1343_v38, %v1335_v63 }
 0xfb0   : > { %2020 = vtanh.f32 %v2887_v1 }
 0xfb6   : > { %v2021_v9 = vpop.eup %2020 }
 0xfb7   : > { %1359 = vrot.lane.b32.xlu1 %v2021_v9, %s2274_s28 }
 0xfc6   : > { %v1354_v7 = vpop.permute.xlu0 %1353 }
 0xfc7   : > { %v2892_v6 = vadd.f32 %v1354_v7, %v1346_v12 }
 0xfc9   : > { %2022 = vtanh.f32 %v2892_v6 }
 0xfcf   : > { %v2023_v19 = vpop.eup %2022 }
 0xfd0   : > { %1365 = vrot.lane.b32.xlu2 %v2023_v19, %s2274_s28 }
0x1029   : > { %v1360_v16 = vpop.permute.xlu1 %1359 }
0x102a   : > { %v1366_v11 = vpop.permute.xlu2 %1365  ;;  %v1362_v45 = vmul.f32 %v1360_v16, %v1312_v56 }
0x102b   : > { %v1368_v15 = vmul.f32 %v1366_v11, %v1331_v58 }
0x102c   : > { %1370 = vrot.lane.b32.xlu0 %v1362_v45, %s2275_s29 }
0x102d   : > { %1374 = vrot.lane.b32.xlu1 %v1368_v15, %s2276_s0 }
0x109e   : > { %v2898_v60 = vpop.permute.xlu0 %1370 }
0x109f   : > { %v2900_v3 = vpop.permute.xlu1 %1374 }
0x10a0   : > { %v1377_v0 = vsel %vm585_vm10, %v2898_v60, %v2900_v3 }
0x10a1   : > { %1813 = vmatmul.msk.f32.vlgmr.msra.gmra.mxu0 %vm386_vm1, %v1377_v0  ;;  %1814 = vmatmul.msk.f32.vlgmr.msra.gmra.mxu1 %vm386_vm1, %v1377_v0 }
0x111e   : > { %v1398_v8 = vpop.f32.mrf.mxu0  ;;  %v1418_v10 = vpop.f32.mrf.mxu1 }
0x111f   : > { %v1423_v13 = vadd.f32 %v1421_v5, %v1398_v8  ;;  %v1424_v14 = vadd.f32 %v1418_v10, %v2657_v41 }
0x1121   : > { %2024 = vtanh.f32 %v1423_v13  ;;  %v1815_v39 = vmul.f32 -1.442695, %v1423_v13  ;;  %v1816_v31 = vmul.f32 -1.442695, %v1424_v14 }
0x1122   : > { %2026 = vtanh.f32 %v1424_v14  ;;  %v1531_v14 = vsel %vm585_vm10, %v2844_v21, %v2814_v29  ;;  %v1529_v29 = vsel %vm585_vm10, %v2771_v34, %v2871_v25  ;;  %v1530_v21 = vsel %vm585_vm10, %v2812_v61, %v2846_v23 }
0x1123   : > { %2028 = vpow2.f32 %v1815_v39  ;;  %v1542_v34 = vrot.slane %v1530_v21, 2 }
0x1127   : > { %v2025_v17 = vpop.eup %2024 }
0x1128   : > { %v2027_v37 = vpop.eup %2026  ;;  %1467 = vrot.lane.b32.xlu2 %v2025_v17, %s2274_s28 }
0x1129   : > { %1478 = vrot.lane.b32.xlu0 %v2027_v37, %s2274_s28  ;;  %v2029_v55 = vpop.eup %2028 }
0x112a   : > { %v1428_v18 = vadd.f32 1.0, %v2029_v55 }
0x112c   : > { %2030 = vrcp.f32 %v1428_v18  ;;  %v1440_v33 = vand.u32 2147483648, %v1428_v18  ;;  %vm1434_vm3 = vweird.f32 %v1428_v18  ;;  %v1438_v35 = vand.u32 2147483647, %v1428_v18 }
0x112d   : > { %2032 = vpow2.f32 %v1816_v31 }
0x112e   : > { %v1441_v47 = vor.u32 1.1754944e-38, %v1440_v33  ;;  %vm1439_vm5 = vcmp.eq.f32.partialorder %v1438_v35, 8.507059e+37 }
0x1132   : > { %v2031_v20 = vpop.eup %2030 }
0x1133   : > { %v1430_v22 = vmul.f32 %v2031_v20, %v1428_v18  ;;  %v2033_v41 = vpop.eup %2032  ;;  %vm1435_vm2 = vweird.f32 %v2031_v20  ;;  %v1539_v18 = vrot.slane %v1529_v29, 4 }
0x1134   : > { %v1447_v28 = vadd.f32 1.0, %v2033_v41  ;;  %vm1436_vm4 = vmor %vm1434_vm3, %vm1435_vm2 }
0x1135   : > { %v1431_v24 = vsub.f32 1.0, %v1430_v22 }
0x1136   : > { %2034 = vrcp.f32 %v1447_v28  ;;  %v1459_v51 = vand.u32 2147483648, %v1447_v28  ;;  %vm1453_vm7 = vweird.f32 %v1447_v28  ;;  %v1457_v54 = vand.u32 2147483647, %v1447_v28 }
0x1137   : > { %v1432_v26 = vmul.f32 %v2031_v20, %v1431_v24 }
0x1138   : > { %v1460_v57 = vor.u32 1.1754944e-38, %v1459_v51  ;;  %vm1458_vm9 = vcmp.eq.f32.partialorder %v1457_v54, 8.507059e+37 }
0x1139   : > { %v1433_v30 = vadd.f32 %v2031_v20, %v1432_v26 }
0x113b   : > { %v1437_v43 = vsel %vm1436_vm4, %v2031_v20, %v1433_v30 }
0x113c   : > { %v1442_v40 = vsel %vm1439_vm5, %v1441_v47, %v1437_v43  ;;  %v2035_v44 = vpop.eup %2034 }
0x113d   : > { %v1449_v46 = vmul.f32 %v2035_v44, %v1447_v28  ;;  %vm1454_vm6 = vweird.f32 %v2035_v44  ;;  %v1465_v63 = vmul.f32 %v1442_v40, %v2887_v1  ;;  %v1532_v1 = vsel %vm585_vm10, %v2873_v27, %v2769_v32 }
0x113e   : > { %vm1455_vm8 = vmor %vm1453_vm7, %vm1454_vm6  ;;  %v1545_v8 = vrot.slane %v1532_v1, 6 }
0x113f   : > { %v1450_v48 = vsub.f32 1.0, %v1449_v46 }
0x1140   : > { %v1559_v27 = vsel %vm1553_vm11, %v1531_v14, %v1545_v8 }
0x1141   : > { %v1451_v49 = vmul.f32 %v2035_v44, %v1450_v48 }
0x1143   : > { %v1452_v50 = vadd.f32 %v2035_v44, %v1451_v49 }
0x1145   : > { %v1456_v56 = vsel %vm1455_vm8, %v2035_v44, %v1452_v50 }
0x1146   : > { %v1461_v59 = vsel %vm1458_vm9, %v1460_v57, %v1456_v56 }
0x1147   : > { %v1476_v38 = vmul.f32 %v1461_v59, %v2892_v6  ;;  %v1533_v6 = vsel %vm585_vm10, %v2898_v60, %v2728_v4 }
0x1148   : > { %v1548_v10 = vrot.slane %v1533_v6, 4 }
0x114a   : > { %v1560_v4 = vsel %vm1555_vm12, %v1559_v27, %v1548_v10 }
0x1182   : > { %v1468_v36 = vpop.permute.xlu2 %1467 }
0x1183   : > { %v1470_v42 = vmul.f32 %v1468_v36, %v1442_v40 }
0x1185   : > { %1472 = vrot.lane.b32.xlu1 %v1470_v42, %s2274_s28 }
0x119b   : > { %v1479_v58 = vpop.permute.xlu0 %1478 }
0x119c   : > { %v1481_v62 = vmul.f32 %v1479_v58, %v1461_v59 }
0x119e   : > { %1483 = vrot.lane.b32.xlu2 %v1481_v62, %s2274_s28 }
0x11f7   : > { %v1473_v9 = vpop.permute.xlu1 %1472 }
0x11f8   : > { %v1484_v12 = vpop.permute.xlu2 %1483  ;;  %v1475_v7 = vadd.f32 %v1473_v9, %v1465_v63 }
0x11f9   : > { %v1486_v19 = vadd.f32 %v1484_v12, %v1476_v38 }
0x11fa   : > { %2036 = vtanh.f32 %v1475_v7 }
0x11fb   : > { %2038 = vtanh.f32 %v1486_v19 }
0x1200   : > { %v2037_v16 = vpop.eup %2036 }
0x1201   : > { %v2039_v11 = vpop.eup %2038  ;;  %1489 = vrot.lane.b32.xlu0 %v2037_v16, %s2274_s28 }
0x1202   : > { %1495 = vrot.lane.b32.xlu1 %v2039_v11, %s2274_s28 }
0x1273   : > { %v1490_v45 = vpop.permute.xlu0 %1489 }
0x1274   : > { %v1496_v15 = vpop.permute.xlu1 %1495  ;;  %v1492_v0 = vmul.f32 %v1490_v45, %v1442_v40 }
0x1275   : > { %v1498_v5 = vmul.f32 %v1496_v15, %v1461_v59 }
0x1276   : > { %1500 = vrot.lane.b32.xlu2 %v1492_v0, %s2275_s29 }
0x1277   : > { %1504 = vrot.lane.b32.xlu0 %v1498_v5, %s2276_s0 }
0x127e   : > { %1517 = vrot.lane.b32.xlu2 %v1475_v7, %s2276_s0 }
0x127f   : > { %1522 = vrot.lane.b32.xlu0 %v1486_v19, %s2276_s0 }
0x12d0   : > { %v1501_v13 = vpop.permute.xlu2 %1500 }
0x12d1   : > { %v1534_v17 = vsel %vm585_vm10, %v1501_v13, %v2683_v53  ;;  %v1528_v53 = vsel %vm585_vm10, %v2726_v2, %v2900_v3 }
0x12d2   : > { %v1551_v32 = vrot.slane %v1534_v17, 2  ;;  %v1536_v39 = vrot.slane %v1528_v53, 6 }
0x12d4   : > { %v1561_v60 = vsel %vm1557_vm13, %v1560_v4, %v1551_v32 }
0x12d5   : > { %1563 = vst.msk [vmem:[#allocation2 + $0x8] sm:$0xff] %vm386_vm1, %v1561_v60 }
0x12d8   : > { %v1518_v37 = vpop.permute.xlu2 %1517 }
0x12d9   : > { %1520 = vst.msk [vmem:[%s2500_s17] sm:$0x3] %vm1508_vm14, %v1518_v37 }
0x12e9   : > { %v1505_v55 = vpop.permute.xlu0 %1504 }
0x12ea   : > { %v1527_v20 = vsel %vm585_vm10, %v2681_v52, %v1505_v55  ;;  %v1507_v2 = vsel %vm585_vm10, %v1501_v13, %v1505_v55 }
0x12eb   : > { %v1554_v25 = vsel %vm1553_vm11, %v1527_v20, %v1536_v39  ;;  %1511 = vrot.lane.b32.xlu1 %v1507_v2, %s2276_s0  ;;  %1509 = vst.msk [vmem:[%s2498_s12] sm:$0x3] %vm1508_vm14, %v1507_v2 }
0x12ec   : > { %v1556_v61 = vsel %vm1555_vm12, %v1554_v25, %v1539_v18 }
0x12ed   : > { %v1558_v52 = vsel %vm1557_vm13, %v1556_v61, %v1542_v34 }
0x12ee   : > { %1562 = vst.msk [vmem:[#allocation2] sm:$0xff] %vm386_vm1, %v1558_v52 }
0x12f1   : > { %v1523_v23 = vpop.permute.xlu0 %1522 }
0x12f2   : > { %1818 = vst.msk [vmem:[%s2500_s17 + $0x2] sm:$0x3] %vm1508_vm14, %v1523_v23 }
0x12f3   : > { %2187 = shalt.err (!%p2184_p7)
}
0x12f4   : > { %s2277_s22 = smov 2   ;;  %s3056_s30 = sld [smem:[#allocation27_spill]] }
0x12f5   : > { %1842 = dma.vmem_to_hbm [thread:$0]  (%p2408_p11), %s1600_s6, 64, %s1602_s20, %s1570_s25, %s2274_s28, %s2274_s28, %s2277_s22  }
0x12f6   : > { %s1582_s17 = sshll.u32 %s2498_s12, 4  ;;  %s1565_s0 = scalar_lea.sflag [#allocation5], %s2478_s4  ;;  %s1583_s17 = int_to_ptr.vmem [resolvable:$true] %s1582_s17 }
0x12fa   : > { %s1581_s7 = scalar_lea.hbm %s3056_s30, %s1829_s1  ;;  %s2208_s6 = scalar_lea.hbm %s3056_s30, 8 }
0x12fb   : > { %s1584_s29 = sshll.u32 %s1581_s7, 4  ;;  %s1585_s29 = int_to_ptr.hbm [resolvable:$true] %s1584_s29 }
0x12fc   : > { %s2202_s26 = sshra.s32 %s1585_s29, 4  ;;  %s2203_s26 = int_to_ptr.hbm [resolvable:$true] %s2202_s26 }
0x12fd   : > { %s2204_s14 = scalar_lea.hbm %s2203_s26, 4  ;;  %p2209_p0 = scmp.lt.s32.totalorder %s2203_s26, %s3056_s30 }
0x12fe   : > { %p2205_p10 = scmp.ne.s32.totalorder %s2203_s26, %s2204_s14  ;;  %p2210_p3 = scmp.lt.s32.totalorder %s2208_s6, %s2204_s14 }
0x1300   : > { %p2206_p13 = pnand %p2205_p10, %p2408_p11  ;;  %p2211_p6 = por %p2210_p3, %p2209_p0 }
0x1302   : > { %p2207_p8 = pneg %p2206_p13 }
0x1304   : > { %p2212_p9 = pnand %p2211_p6, %p2207_p8 }
0x135d   : > { %v1512_v3 = vpop.permute.xlu1 %1511 }
0x135e   : > { %1817 = vst.msk [vmem:[%s2498_s12 + $0x2] sm:$0x3] %vm1508_vm14, %v1512_v3 }
0x135f   : > { %2215 = shalt.err (!%p2212_p9)
}
0x1360   : > { %1841 = dma.vmem_to_hbm [thread:$0]  (%p2408_p11), %s1583_s17, 64, %s1585_s29, %s1565_s0, %s2274_s28, %s2274_s28, %s2277_s22  }
0x1361 PF: > { %s3057_s4 = sld [smem:[#allocation19_spill]]  ;;  %p3059_p4 = scmp.ge.s32.totalorder %s2266_s21, 2 }
0x1363   : > { %p1860_p1 = pnand %p3059_p4, %p2412_p12 }
0x1365   : > { %p1861_p5 = pneg %p1860_p1 }
0x1367   : > { %s1616_s25 = sand.u32 1, %s3057_s4  }
0x1368   : > { %s1617_s15 = scalar_lea.sflag [#allocation5], %s1616_s25 }
0x1369   : > { %2245 = dma.done.wait (%p1861_p5), %s1617_s15, 64  }
0x136a   : > { %2247 = vsyncadd (%p1861_p5), %s1617_s15, 4294967232  ;;  %s1627_s9 = scalar_lea.sflag [#allocation13], %s1616_s25 }
0x136b   : > { %2249 = dma.done.wait (%p1861_p5), %s1627_s9, 64  }
0x136c   : > { %2251 = vsyncadd (%p1861_p5), %s1627_s9, 4294967232  ;;  %s3060_s21 = sld [smem:[#allocation21_spill]]  ;;  %s3063_s18 = smov %s2258_s19 }
0x136d   : > { %s3061_s8 = sld [smem:[#allocation20_spill]] }
0x136e   : > { %s3062_s20 = sld [smem:[#allocation22_spill]] }
0x1372   : > { %p26_p11 = scmp.ge.s32.totalorder %s3060_s21, 4  }
0x1373   : > { %s3064_s19 = smov %s3061_s8 }
0x1374   :  { %28 = sbr.rel (!%p26_p11) target bundleno = 15 (0xf), region = 133 }
0x1379   :  { %1633 = vsyncpa [#allocation4], 1 }
0x137a   :  { %1635 = vsyncpa [#allocation4 + $0x1], 1 }
0x137b   :  { %1636 = vsyncpa [#allocation7], 1 }
0x137c   :  { %1638 = vsyncpa [#allocation7 + $0x1], 1 }
0x137d   :  { %1639 = vsyncpa [#allocation10], 1 }
0x137e   :  { %1641 = vsyncpa [#allocation10 + $0x1], 1 }
0x137f   :  { %1642 = vsyncpa [#allocation5], 1 }
0x1380   :  { %1644 = vsyncpa [#allocation5 + $0x1], 1 }
0x1381   :  { %1645 = vsyncpa [#allocation13], 1 }
0x1382   :  { %1647 = vsyncpa [#allocation13 + $0x1], 1 }

</bundles_post_ra>
